<compile_context>
chip_gen: v7x
topology: tpu7x:2x2x1
jax: 0.10.0
libtpu: 0.0.40
codegen_flags: <defaults>
</compile_context>

<pallas_src>
import math
from functools import partial

import jax
import jax.numpy as jnp
from jax import lax
from jax.experimental import pallas as pl
from jax.experimental.pallas import tpu as pltpu

LN_EPS = 1e-5  # PyTorch LayerNorm / TransformerDecoderLayer default


# --------------------------------------------------------------------------
# Tiling helpers
# --------------------------------------------------------------------------

def _round_up(x, m):
    return ((x + m - 1) // m) * m


def _tile_m(M, max_tile=512):
    """Return (Mp, TM): padded folded-M and a tile that divides Mp.

    Pads at most up to the next multiple of 8 in the common case, so the
    wrapper-side pad/slice HBM copies the previous version did on every call
    vanish for realistic shapes."""
    Mp = _round_up(M, 8)
    if Mp <= max_tile:
        return Mp, Mp
    tm = max_tile - (max_tile % 8)
    while Mp % tm != 0:
        tm -= 8
        if tm < 64:  # no reasonable divisor -> fall back to padding
            return _round_up(M, max_tile), max_tile
    return Mp, tm


def _tile_n(N, max_tile=2048):
    """N (lane) tiling for the vocab projection: keeps the resident weight
    block bounded so it fits v7x's smaller VMEM and keeps stores lane-dense."""
    if N <= max_tile:
        return N, N
    tn = max_tile - (max_tile % 128)
    while N % tn != 0:
        tn -= 128
        if tn < 128:
            return _round_up(N, max_tile), max_tile
    return N, tn


# --------------------------------------------------------------------------
# Kernels
# --------------------------------------------------------------------------

def _linear_kernel(x_ref, w_ref, b_ref, o_ref, *, activation=None):
    # x: (TM, K)   w: (K, N) resident   b: (1, N) resident  ->  (TM, N)
    y = jnp.dot(x_ref[...], w_ref[...], preferred_element_type=jnp.float32)
    y = y + b_ref[...]
    if activation == "relu":
        y = jnp.maximum(y, 0.0)
    o_ref[...] = y.astype(o_ref.dtype)


def _proj_add_ln_kernel(x_ref, w_ref, b_ref, r_ref, g_ref, bt_ref, o_ref):
    # fused: (attention ctx) @ Wo + bo  ->  + residual  ->  LayerNorm
    y = jnp.dot(x_ref[...], w_ref[...], preferred_element_type=jnp.float32)
    y = y + b_ref[...] + r_ref[...]
    mu = jnp.mean(y, axis=-1, keepdims=True)
    var = jnp.mean(jnp.square(y - mu), axis=-1, keepdims=True)
    yn = (y - mu) * lax.rsqrt(var + LN_EPS)
    o_ref[...] = (yn * g_ref[...] + bt_ref[...]).astype(o_ref.dtype)


def _ffn_ln_kernel(x_ref, w1_ref, b1_ref, w2_ref, b2_ref, g_ref, bt_ref, o_ref):
    # fused FFN block: relu(x@W1+b1)@W2+b2  ->  + x  ->  LayerNorm
    # the (TM, ff_dim) hidden activation lives only in VMEM/vregs.
    x = x_ref[...]
    h = jnp.dot(x, w1_ref[...], preferred_element_type=jnp.float32) + b1_ref[...]
    h = jnp.maximum(h, 0.0)
    y = jnp.dot(h, w2_ref[...], preferred_element_type=jnp.float32) + b2_ref[...]
    y = y + x
    mu = jnp.mean(y, axis=-1, keepdims=True)
    var = jnp.mean(jnp.square(y - mu), axis=-1, keepdims=True)
    yn = (y - mu) * lax.rsqrt(var + LN_EPS)
    o_ref[...] = (yn * g_ref[...] + bt_ref[...]).astype(o_ref.dtype)


def _ln_linear_kernel(x_ref, g_ref, b_ref, w_ref, bias_ref, o_ref):
    # fused: final LayerNorm (prologue) + vocab projection tile
    x = x_ref[...]
    mu = jnp.mean(x, axis=-1, keepdims=True)
    var = jnp.mean(jnp.square(x - mu), axis=-1, keepdims=True)
    xn = (x - mu) * lax.rsqrt(var + LN_EPS) * g_ref[...] + b_ref[...]
    y = jnp.dot(xn, w_ref[...], preferred_element_type=jnp.float32) + bias_ref[...]
    o_ref[...] = y.astype(o_ref.dtype)


def _self_attn_kernel(qkv_ref, m_ref, o_ref, *, num_heads, scale):
    # one batch element per grid step; all heads handled inside the kernel.
    # qkv: (1, S, 3D) in projection layout; mask: (S, S) additive; out: (1, S, D)
    D = qkv_ref.shape[2] // 3
    Dh = D // num_heads
    mask = m_ref[...]
    outs = []
    for h in range(num_heads):  # static unroll over heads
        q = qkv_ref[0, :, h * Dh:(h + 1) * Dh]
        k = qkv_ref[0, :, D + h * Dh:D + (h + 1) * Dh]
        v = qkv_ref[0, :, 2 * D + h * Dh:2 * D + (h + 1) * Dh]
        s = lax.dot_general(q, k, (((1,), (1,)), ((), ())),
                            preferred_element_type=jnp.float32) * scale
        s = s + mask
        s = s - jnp.max(s, axis=-1, keepdims=True)
        p = jnp.exp(s)
        p = p * pl.reciprocal(jnp.sum(p, axis=-1, keepdims=True), approx=True)
        outs.append(jnp.dot(p, v, preferred_element_type=jnp.float32))
    # single lane-dense (S, D) store
    o_ref[0] = jnp.concatenate(outs, axis=-1).astype(o_ref.dtype)


def _cross_attn_kernel(q_ref, kv_ref, o_ref, *, num_heads, scale):
    # q: (1, S, D); kv: (1, Sm, 2D); no mask (memory attention); out: (1, S, D)
    D = q_ref.shape[2]
    Dh = D // num_heads
    outs = []
    for h in range(num_heads):
        q = q_ref[0, :, h * Dh:(h + 1) * Dh]
        k = kv_ref[0, :, h * Dh:(h + 1) * Dh]
        v = kv_ref[0, :, D + h * Dh:D + (h + 1) * Dh]
        s = lax.dot_general(q, k, (((1,), (1,)), ((), ())),
                            preferred_element_type=jnp.float32) * scale
        s = s - jnp.max(s, axis=-1, keepdims=True)
        p = jnp.exp(s)
        p = p * pl.reciprocal(jnp.sum(p, axis=-1, keepdims=True), approx=True)
        outs.append(jnp.dot(p, v, preferred_element_type=jnp.float32))
    o_ref[0] = jnp.concatenate(outs, axis=-1).astype(o_ref.dtype)


# --------------------------------------------------------------------------
# Pallas wrappers
# --------------------------------------------------------------------------

def linear(x2d, w, b, activation=None, max_tm=512):
    """x2d: (M, K) folded batch*seq; w: (K, N); b: (N,) -> (M, N)."""
    M, K = x2d.shape
    N = w.shape[1]
    Mp, TM = _tile_m(M, max_tm)
    xp = x2d if Mp == M else jnp.pad(x2d, ((0, Mp - M), (0, 0)))
    out = pl.pallas_call(
        partial(_linear_kernel, activation=activation),
        out_shape=jax.ShapeDtypeStruct((Mp, N), jnp.float32),
        grid_spec=pltpu.PrefetchScalarGridSpec(
            num_scalar_prefetch=0,
            grid=(Mp // TM,),
            in_specs=[
                pl.BlockSpec((TM, K), lambda i: (i, 0)),
                pl.BlockSpec((K, N), lambda i: (0, 0)),   # resident weight
                pl.BlockSpec((1, N), lambda i: (0, 0)),   # resident bias
            ],
            out_specs=pl.BlockSpec((TM, N), lambda i: (i, 0)),
        ),
        compiler_params=pltpu.CompilerParams(dimension_semantics=("parallel",)),
    )(xp, w, b.reshape(1, N))
    return out if Mp == M else out[:M]


def proj_add_ln(x2d, w, b, residual, gamma, beta, max_tm=512):
    """Fused output projection + residual add + LayerNorm (post-norm)."""
    M, K = x2d.shape
    D = w.shape[1]
    Mp, TM = _tile_m(M, max_tm)
    if Mp != M:
        x2d = jnp.pad(x2d, ((0, Mp - M), (0, 0)))
        residual = jnp.pad(residual, ((0, Mp - M), (0, 0)))
    row_in = pl.BlockSpec((TM, K), lambda i: (i, 0))
    row_d = pl.BlockSpec((TM, D), lambda i: (i, 0))
    vec_d = pl.BlockSpec((1, D), lambda i: (0, 0))
    out = pl.pallas_call(
        _proj_add_ln_kernel,
        out_shape=jax.ShapeDtypeStruct((Mp, D), jnp.float32),
        grid_spec=pltpu.PrefetchScalarGridSpec(
            num_scalar_prefetch=0,
            grid=(Mp // TM,),
            in_specs=[row_in,
                      pl.BlockSpec((K, D), lambda i: (0, 0)),
                      vec_d, row_d, vec_d, vec_d],
            out_specs=row_d,
        ),
        compiler_params=pltpu.CompilerParams(dimension_semantics=("parallel",)),
    )(x2d, w, b.reshape(1, D), residual, gamma.reshape(1, D), beta.reshape(1, D))
    return out if Mp == M else out[:M]


def ffn_ln(x2d, w1, b1, w2, b2, gamma, beta, max_tm=512):
    """Fused feed-forward block: relu(x@W1+b1)@W2+b2 + x -> LayerNorm."""
    M, D = x2d.shape
    F = w1.shape[1]
    Mp, TM = _tile_m(M, max_tm)
    xp = x2d if Mp == M else jnp.pad(x2d, ((0, Mp - M), (0, 0)))
    row_d = pl.BlockSpec((TM, D), lambda i: (i, 0))
    vec_d = pl.BlockSpec((1, D), lambda i: (0, 0))
    out = pl.pallas_call(
        _ffn_ln_kernel,
        out_shape=jax.ShapeDtypeStruct((Mp, D), jnp.float32),
        grid_spec=pltpu.PrefetchScalarGridSpec(
            num_scalar_prefetch=0,
            grid=(Mp // TM,),
            in_specs=[row_d,
                      pl.BlockSpec((D, F), lambda i: (0, 0)),   # resident W1
                      pl.BlockSpec((1, F), lambda i: (0, 0)),
                      pl.BlockSpec((F, D), lambda i: (0, 0)),   # resident W2
                      vec_d, vec_d, vec_d],
            out_specs=row_d,
        ),
        compiler_params=pltpu.CompilerParams(dimension_semantics=("parallel",)),
    )(xp, w1, b1.reshape(1, F), w2, b2.reshape(1, D),
      gamma.reshape(1, D), beta.reshape(1, D))
    return out if Mp == M else out[:M]


def ln_linear(x2d, gamma, beta, w, b, max_tm=512, max_tn=2048):
    """Fused final LayerNorm + vocab projection, with optional N (lane) tiling
    so the resident weight / output blocks stay within v7x VMEM limits."""
    M, D = x2d.shape
    N = w.shape[1]
    Mp, TM = _tile_m(M, max_tm)
    Np, TN = _tile_n(N, max_tn)
    xp = x2d if Mp == M else jnp.pad(x2d, ((0, Mp - M), (0, 0)))
    wp = w if Np == N else jnp.pad(w, ((0, 0), (0, Np - N)))
    bp = b if Np == N else jnp.pad(b, ((0, Np - N),))
    out = pl.pallas_call(
        _ln_linear_kernel,
        out_shape=jax.ShapeDtypeStruct((Mp, Np), jnp.float32),
        grid_spec=pltpu.PrefetchScalarGridSpec(
            num_scalar_prefetch=0,
            grid=(Mp // TM, Np // TN),
            in_specs=[pl.BlockSpec((TM, D), lambda i, j: (i, 0)),
                      pl.BlockSpec((1, D), lambda i, j: (0, 0)),
                      pl.BlockSpec((1, D), lambda i, j: (0, 0)),
                      pl.BlockSpec((D, TN), lambda i, j: (0, j)),
                      pl.BlockSpec((1, TN), lambda i, j: (0, j))],
            out_specs=pl.BlockSpec((TM, TN), lambda i, j: (i, j)),
        ),
        compiler_params=pltpu.CompilerParams(
            dimension_semantics=("parallel", "parallel")),
    )(xp, gamma.reshape(1, D), beta.reshape(1, D), wp, bp.reshape(1, Np))
    if Mp != M or Np != N:
        out = out[:M, :N]
    return out


def self_attention(qkv, mask, num_heads):
    """qkv: (B, S, 3D) in projection layout; mask: (S, S) additive -> (B, S, D)."""
    B, S, D3 = qkv.shape
    D = D3 // 3
    scale = 1.0 / math.sqrt(D // num_heads)
    return pl.pallas_call(
        partial(_self_attn_kernel, num_heads=num_heads, scale=scale),
        out_shape=jax.ShapeDtypeStruct((B, S, D), jnp.float32),
        grid_spec=pltpu.PrefetchScalarGridSpec(
            num_scalar_prefetch=0,
            grid=(B,),
            in_specs=[pl.BlockSpec((1, S, D3), lambda b: (b, 0, 0)),
                      pl.BlockSpec((S, S), lambda b: (0, 0))],   # resident mask
            out_specs=pl.BlockSpec((1, S, D), lambda b: (b, 0, 0)),
        ),
        compiler_params=pltpu.CompilerParams(dimension_semantics=("parallel",)),
    )(qkv, mask)


def cross_attention(q, kv, num_heads):
    """q: (B, S, D); kv: (B, Sm, 2D) in projection layout -> (B, S, D)."""
    B, S, D = q.shape
    Sm = kv.shape[1]
    scale = 1.0 / math.sqrt(D // num_heads)
    return pl.pallas_call(
        partial(_cross_attn_kernel, num_heads=num_heads, scale=scale),
        out_shape=jax.ShapeDtypeStruct((B, S, D), jnp.float32),
        grid_spec=pltpu.PrefetchScalarGridSpec(
            num_scalar_prefetch=0,
            grid=(B,),
            in_specs=[pl.BlockSpec((1, S, D), lambda b: (b, 0, 0)),
                      pl.BlockSpec((1, Sm, 2 * D), lambda b: (b, 0, 0))],
            out_specs=pl.BlockSpec((1, S, D), lambda b: (b, 0, 0)),
        ),
        compiler_params=pltpu.CompilerParams(dimension_semantics=("parallel",)),
    )(q, kv)


# --------------------------------------------------------------------------
# Decoder layer + full forward
# --------------------------------------------------------------------------

def decoder_layer(x, memory, lp, tgt_mask, num_heads):
    """One TransformerDecoderLayer (post-norm, ReLU FFN, eval mode)."""
    B, S, D = x.shape
    Sm = memory.shape[1]
    x_flat = x.reshape(B * S, D)

    # --- self-attention block (fused QKV proj; fused Wo + residual + LN1) ---
    qkv = linear(x_flat, lp["sa_w_qkv"], lp["sa_b_qkv"])              # (M, 3D)
    ctx = self_attention(qkv.reshape(B, S, 3 * D), tgt_mask, num_heads)
    x_flat = proj_add_ln(ctx.reshape(B * S, D), lp["sa_wo"], lp["sa_bo"],
                         x_flat, lp["ln1_g"], lp["ln1_b"])

    # --- cross-attention block (fused KV proj; no mask; Wo + residual + LN2) ---
    q = linear(x_flat, lp["ca_wq"], lp["ca_bq"])                      # (M, D)
    kv = linear(memory.reshape(B * Sm, D), lp["ca_w_kv"], lp["ca_b_kv"])
    ctx = cross_attention(q.reshape(B, S, D), kv.reshape(B, Sm, 2 * D), num_heads)
    x_flat = proj_add_ln(ctx.reshape(B * S, D), lp["ca_wo"], lp["ca_bo"],
                         x_flat, lp["ln2_g"], lp["ln2_b"])

    # --- feed-forward block, single fused kernel (incl. residual + LN3) ---
    x_flat = ffn_ln(x_flat, lp["ff_w1"], lp["ff_b1"], lp["ff_w2"], lp["ff_b2"],
                    lp["ln3_g"], lp["ln3_b"])
    return x_flat.reshape(B, S, D)


def latex_decoder_forward(params, features, tgt, tgt_mask, *, num_heads):
    """features: (B, Sm, D) memory; tgt: (B, S) int32 token ids; tgt_mask: (S, S)."""
    B, S = tgt.shape
    D = params["embedding"].shape[1]
    # NOTE: PyTorch computes `self.embedding(tgt) * sqrt(tgt.size(-1))` where tgt
    # is still the (B, S) token tensor, i.e. the scale is sqrt(seq_len).
    scale = math.sqrt(S)
    # TODO(synk): the nn.Embedding token gather is data-dependent; it stays an
    # XLA jnp.take. The *sqrt(S) scale and positional add fuse with the gather.
    x = jnp.take(params["embedding"], tgt, axis=0) * scale + params["pe"][:S][None]
    for lp in params["layers"]:
        x = decoder_layer(x, features, lp, tgt_mask, num_heads)
    logits = ln_linear(x.reshape(B * S, D), params["norm_g"], params["norm_b"],
                       params["fc_w"], params["fc_b"])
    return logits.reshape(B, S, -1)


# --------------------------------------------------------------------------
# Parameter construction (+ one-time fusion prep) and pure-JAX reference
# --------------------------------------------------------------------------

def make_positional_encoding(max_len, d_model):
    position = jnp.arange(max_len, dtype=jnp.float32)[:, None]
    div_term = jnp.exp(jnp.arange(0, d_model, 2, dtype=jnp.float32)
                       * (-math.log(10000.0) / d_model))
    pe = jnp.zeros((max_len, d_model), jnp.float32)
    pe = pe.at[:, 0::2].set(jnp.sin(position * div_term))
    pe = pe.at[:, 1::2].set(jnp.cos(position * div_term))
    return pe


def init_params(key, vocab_size, embed_dim, num_layers, ff_dim, max_len=500):
    def w(k, shape, scale=0.02):
        return jax.random.normal(k, shape, jnp.float32) * scale

    keys = jax.random.split(key, 3 + num_layers)
    params = {
        "embedding": jax.random.normal(keys[0], (vocab_size, embed_dim), jnp.float32),
        "pe": make_positional_encoding(max_len, embed_dim),
        "norm_g": jnp.ones((embed_dim,), jnp.float32),
        "norm_b": jnp.zeros((embed_dim,), jnp.float32),
        "fc_w": w(keys[1], (embed_dim, vocab_size)),
        "fc_b": w(keys[2], (vocab_size,)),
        "layers": [],
    }
    for l in range(num_layers):
        lk = jax.random.split(keys[3 + l], 23)

        def attn(ks):
            return {
                "wq": w(ks[0], (embed_dim, embed_dim)), "bq": w(ks[1], (embed_dim,)),
                "wk": w(ks[2], (embed_dim, embed_dim)), "bk": w(ks[3], (embed_dim,)),
                "wv": w(ks[4], (embed_dim, embed_dim)), "bv": w(ks[5], (embed_dim,)),
                "wo": w(ks[6], (embed_dim, embed_dim)), "bo": w(ks[7], (embed_dim,)),
            }

        params["layers"].append({
            "self_attn": attn(lk[0:8]),
            "cross_attn": attn(lk[8:16]),
            "ff_w1": w(lk[16], (embed_dim, ff_dim)), "ff_b1": w(lk[17], (ff_dim,)),
            "ff_w2": w(lk[18], (ff_dim, embed_dim)), "ff_b2": w(lk[19], (embed_dim,)),
            "ln1_g": jnp.ones((embed_dim,), jnp.float32), "ln1_b": w(lk[20], (embed_dim,)),
            "ln2_g": jnp.ones((embed_dim,), jnp.float32), "ln2_b": w(lk[21], (embed_dim,)),
            "ln3_g": jnp.ones((embed_dim,), jnp.float32), "ln3_b": w(lk[22], (embed_dim,)),
        })
    return params


def prepare_params(params):
    """One-time fusion of QKV / KV weights so per-forward concats disappear."""
    prepared = {
        "embedding": params["embedding"], "pe": params["pe"],
        "norm_g": params["norm_g"], "norm_b": params["norm_b"],
        "fc_w": params["fc_w"], "fc_b": params["fc_b"],
        "layers": [],
    }
    for lp in params["layers"]:
        sa, ca = lp["self_attn"], lp["cross_attn"]
        prepared["layers"].append({
            "sa_w_qkv": jnp.concatenate([sa["wq"], sa["wk"], sa["wv"]], axis=1),
            "sa_b_qkv": jnp.concatenate([sa["bq"], sa["bk"], sa["bv"]], axis=0),
            "sa_wo": sa["wo"], "sa_bo": sa["bo"],
            "ca_wq": ca["wq"], "ca_bq": ca["bq"],
            "ca_w_kv": jnp.concatenate([ca["wk"], ca["wv"]], axis=1),
            "ca_b_kv": jnp.concatenate([ca["bk"], ca["bv"]], axis=0),
            "ca_wo": ca["wo"], "ca_bo": ca["bo"],
            "ff_w1": lp["ff_w1"], "ff_b1": lp["ff_b1"],
            "ff_w2": lp["ff_w2"], "ff_b2": lp["ff_b2"],
            "ln1_g": lp["ln1_g"], "ln1_b": lp["ln1_b"],
            "ln2_g": lp["ln2_g"], "ln2_b": lp["ln2_b"],
            "ln3_g": lp["ln3_g"], "ln3_b": lp["ln3_b"],
        })
    return prepared


def _ln_ref(x, g, b):
    mu = jnp.mean(x, axis=-1, keepdims=True)
    var = jnp.mean(jnp.square(x - mu), axis=-1, keepdims=True)
    return (x - mu) * lax.rsqrt(var + LN_EPS) * g + b


def _mha_ref(x_q, x_kv, p, mask, num_heads):
    B, Sq, D = x_q.shape
    Sk = x_kv.shape[1]
    H = num_heads
    Dh = D // H
    q = (x_q @ p["wq"] + p["bq"]).reshape(B, Sq, H, Dh).transpose(0, 2, 1, 3)
    k = (x_kv @ p["wk"] + p["bk"]).reshape(B, Sk, H, Dh).transpose(0, 2, 1, 3)
    v = (x_kv @ p["wv"] + p["bv"]).reshape(B, Sk, H, Dh).transpose(0, 2, 1, 3)
    s = jnp.einsum("bhqd,bhkd->bhqk", q, k) / math.sqrt(Dh)
    if mask is not None:
        s = s + mask
    a = jax.nn.softmax(s, axis=-1)
    o = jnp.einsum("bhqk,bhkd->bhqd", a, v)
    o = o.transpose(0, 2, 1, 3).reshape(B, Sq, D)
    return o @ p["wo"] + p["bo"]


def reference_forward(params, features, tgt, tgt_mask, *, num_heads):
    B, S = tgt.shape
    x = jnp.take(params["embedding"], tgt, axis=0) * math.sqrt(S)
    x = x + params["pe"][:S][None]
    for lp in params["layers"]:
        sa = _mha_ref(x, x, lp["self_attn"], tgt_mask, num_heads)
        x = _ln_ref(x + sa, lp["ln1_g"], lp["ln1_b"])
        ca = _mha_ref(x, features, lp["cross_attn"], None, num_heads)
        x = _ln_ref(x + ca, lp["ln2_g"], lp["ln2_b"])
        h = jnp.maximum(x @ lp["ff_w1"] + lp["ff_b1"], 0.0)
        h = h @ lp["ff_w2"] + lp["ff_b2"]
        x = _ln_ref(x + h, lp["ln3_g"], lp["ln3_b"])
    x = _ln_ref(x, params["norm_g"], params["norm_b"])
    return x @ params["fc_w"] + params["fc_b"]


# --------------------------------------------------------------------------
# Main
# --------------------------------------------------------------------------

if __name__ == "__main__":
    VOCAB = 64
    EMBED_DIM = 32
    NUM_HEADS = 4
    NUM_LAYERS = 2
    FF_DIM = 64
    B = 2
    S = 8       # target (LaTeX token) sequence length
    SM = 16     # memory / image-feature sequence length

    key = jax.random.PRNGKey(0)
    k_params, k_feat, k_tgt = jax.random.split(key, 3)

    params = init_params(k_params, VOCAB, EMBED_DIM, NUM_LAYERS, FF_DIM)
    prepared = prepare_params(params)   # one-time QKV / KV weight fusion (outside jit)

    features = jax.random.normal(k_feat, (B, SM, EMBED_DIM), jnp.float32)
    tgt = jax.random.randint(k_tgt, (B, S), 0, VOCAB, dtype=jnp.int32)
    # standard causal mask (additive float): 0 on/below diagonal, -1e9 above
    tgt_mask = jnp.where(jnp.arange(S)[None, :] > jnp.arange(S)[:, None],
                         -1e9, 0.0).astype(jnp.float32)

    fwd = jax.jit(lambda p, f, t, m: latex_decoder_forward(
        p, f, t, m, num_heads=NUM_HEADS))
    out = fwd(prepared, features, tgt, tgt_mask)
    out = jax.block_until_ready(out)

    ref = reference_forward(params, features, tgt, tgt_mask, num_heads=NUM_HEADS)
    ref = jax.block_until_ready(ref)

    assert out.shape == (B, S, VOCAB)
    max_err = float(jnp.max(jnp.abs(out - ref)))
    assert jnp.allclose(out, ref, atol=2e-3, rtol=2e-3), max_err
    print("KERNEL_OK")
</pallas_src>

<mosaic_0001>
module attributes {stable_mosaic.version = 11 : i64} {
  func.func @_linear_kernel(%arg0: i32, %arg1: memref<16x32xf32, #tpu.memory_space<vmem>>, %arg2: memref<32x32xf32, #tpu.memory_space<vmem>>, %arg3: memref<1x32xf32, #tpu.memory_space<vmem>>, %arg4: memref<16x32xf32, #tpu.memory_space<vmem>>) attributes {dimension_semantics = [#tpu.dimension_semantics<parallel>], iteration_bounds = array<i64: 1>, scalar_prefetch = 0 : i64, scratch_operands = 0 : i64, tpu.core_type = #tpu.core_type<tc>, window_params = [{transform_indices = @transform_0, window_bounds = array<i64: 16, 32>}, {pipeline_mode = #tpu.pipeline_mode<synchronous>, transform_indices = @transform_1, window_bounds = array<i64: 32, 32>}, {pipeline_mode = #tpu.pipeline_mode<synchronous>, transform_indices = @transform_2, window_bounds = array<i64: 1, 32>}, {transform_indices = @transform_3, window_bounds = array<i64: 16, 32>}]} {
    %c0 = arith.constant 0 : index
    %c0_0 = arith.constant 0 : index
    %0 = vector.load %arg1[%c0, %c0_0] : memref<16x32xf32, #tpu.memory_space<vmem>>, vector<16x32xf32>
    %c0_1 = arith.constant 0 : index
    %c0_2 = arith.constant 0 : index
    %1 = vector.load %arg2[%c0_1, %c0_2] : memref<32x32xf32, #tpu.memory_space<vmem>>, vector<32x32xf32>
    %cst = arith.constant dense<0.000000e+00> : vector<16x32xf32>
    %2 = tpu.matmul %0, %1, %cst {dimension_numbers = #tpu.dot_dimension_numbers<[1], [0], [0], [1], [0, 0, 1, 1], [], []>} : vector<16x32xf32>, vector<32x32xf32>, vector<16x32xf32> -> vector<16x32xf32>
    %c0_3 = arith.constant 0 : index
    %c0_4 = arith.constant 0 : index
    %3 = vector.load %arg3[%c0_3, %c0_4] : memref<1x32xf32, #tpu.memory_space<vmem>>, vector<1x32xf32>
    %4 = vector.broadcast %3 : vector<1x32xf32> to vector<16x32xf32>
    %5 = arith.addf %2, %4 : vector<16x32xf32>
    %c0_5 = arith.constant 0 : index
    %c0_6 = arith.constant 0 : index
    %6 = vector.load %arg4[%c0_5, %c0_6] : memref<16x32xf32, #tpu.memory_space<vmem>>, vector<16x32xf32>
    tpu.vector_store %arg4[%c0_5, %c0_6], %5 {strides = array<i32>} : memref<16x32xf32, #tpu.memory_space<vmem>>, vector<16x32xf32>,
    return
  }
  func.func @transform_0(%arg0: i32) -> (i32, i32) {
    %c0_i32 = arith.constant 0 : i32
    %c0_i32_0 = arith.constant 0 : i32
    return %arg0, %c0_i32 : i32, i32
  }
  func.func @transform_1(%arg0: i32) -> (i32, i32) {
    %c0_i32 = arith.constant 0 : i32
    %c0_i32_0 = arith.constant 0 : i32
    %c0_i32_1 = arith.constant 0 : i32
    return %c0_i32, %c0_i32_0 : i32, i32
  }
  func.func @transform_2(%arg0: i32) -> (i32, i32) {
    %c0_i32 = arith.constant 0 : i32
    %c0_i32_0 = arith.constant 0 : i32
    %c0_i32_1 = arith.constant 0 : i32
    return %c0_i32, %c0_i32_0 : i32, i32
  }
  func.func @transform_3(%arg0: i32) -> (i32, i32) {
    %c0_i32 = arith.constant 0 : i32
    %c0_i32_0 = arith.constant 0 : i32
    return %arg0, %c0_i32 : i32, i32
  }
}

module attributes {stable_mosaic.version = 11 : i64} {
  func.func @_proj_add_ln_kernel(%arg0: i32, %arg1: memref<16x32xf32, #tpu.memory_space<vmem>>, %arg2: memref<32x32xf32, #tpu.memory_space<vmem>>, %arg3: memref<1x32xf32, #tpu.memory_space<vmem>>, %arg4: memref<16x32xf32, #tpu.memory_space<vmem>>, %arg5: memref<1x32xf32, #tpu.memory_space<vmem>>, %arg6: memref<1x32xf32, #tpu.memory_space<vmem>>, %arg7: memref<16x32xf32, #tpu.memory_space<vmem>>) attributes {dimension_semantics = [#tpu.dimension_semantics<parallel>], iteration_bounds = array<i64: 1>, scalar_prefetch = 0 : i64, scratch_operands = 0 : i64, tpu.core_type = #tpu.core_type<tc>, window_params = [{transform_indices = @transform_0, window_bounds = array<i64: 16, 32>}, {pipeline_mode = #tpu.pipeline_mode<synchronous>, transform_indices = @transform_1, window_bounds = array<i64: 32, 32>}, {pipeline_mode = #tpu.pipeline_mode<synchronous>, transform_indices = @transform_2, window_bounds = array<i64: 1, 32>}, {transform_indices = @transform_3, window_bounds = array<i64: 16, 32>}, {pipeline_mode = #tpu.pipeline_mode<synchronous>, transform_indices = @transform_4, window_bounds = array<i64: 1, 32>}, {pipeline_mode = #tpu.pipeline_mode<synchronous>, transform_indices = @transform_5, window_bounds = array<i64: 1, 32>}, {transform_indices = @transform_6, window_bounds = array<i64: 16, 32>}]} {
    %c0 = arith.constant 0 : index
    %c0_0 = arith.constant 0 : index
    %0 = vector.load %arg1[%c0, %c0_0] : memref<16x32xf32, #tpu.memory_space<vmem>>, vector<16x32xf32>
    %c0_1 = arith.constant 0 : index
    %c0_2 = arith.constant 0 : index
    %1 = vector.load %arg2[%c0_1, %c0_2] : memref<32x32xf32, #tpu.memory_space<vmem>>, vector<32x32xf32>
    %cst = arith.constant dense<0.000000e+00> : vector<16x32xf32>
    %2 = tpu.matmul %0, %1, %cst {dimension_numbers = #tpu.dot_dimension_numbers<[1], [0], [0], [1], [0, 0, 1, 1], [], []>} : vector<16x32xf32>, vector<32x32xf32>, vector<16x32xf32> -> vector<16x32xf32>
    %c0_3 = arith.constant 0 : index
    %c0_4 = arith.constant 0 : index
    %3 = vector.load %arg3[%c0_3, %c0_4] : memref<1x32xf32, #tpu.memory_space<vmem>>, vector<1x32xf32>
    %4 = vector.broadcast %3 : vector<1x32xf32> to vector<16x32xf32>
    %5 = arith.addf %2, %4 : vector<16x32xf32>
    %c0_5 = arith.constant 0 : index
    %c0_6 = arith.constant 0 : index
    %6 = vector.load %arg4[%c0_5, %c0_6] : memref<16x32xf32, #tpu.memory_space<vmem>>, vector<16x32xf32>
    %7 = arith.addf %5, %6 : vector<16x32xf32>
    %cst_7 = arith.constant dense<0.000000e+00> : vector<16xf32>
    %8 = vector.multi_reduction <add>, %7, %cst_7 [1] : vector<16x32xf32> to vector<16xf32>
    %9 = vector.shape_cast %8 : vector<16xf32> to vector<16x1xf32>
    %cst_8 = arith.constant 3.200000e+01 : f32
    %10 = vector.broadcast %cst_8 : f32 to vector<16x1xf32>
    %11 = arith.divf %9, %10 : vector<16x1xf32>
    %12 = vector.broadcast %11 : vector<16x1xf32> to vector<16x32xf32>
    %13 = arith.subf %7, %12 : vector<16x32xf32>
    %14 = arith.mulf %13, %13 : vector<16x32xf32>
    %cst_9 = arith.constant dense<0.000000e+00> : vector<16xf32>
    %15 = vector.multi_reduction <add>, %14, %cst_9 [1] : vector<16x32xf32> to vector<16xf32>
    %16 = vector.shape_cast %15 : vector<16xf32> to vector<16x1xf32>
    %cst_10 = arith.constant 3.200000e+01 : f32
    %17 = vector.broadcast %cst_10 : f32 to vector<16x1xf32>
    %18 = arith.divf %16, %17 : vector<16x1xf32>
    %19 = vector.broadcast %11 : vector<16x1xf32> to vector<16x32xf32>
    %20 = arith.subf %7, %19 : vector<16x32xf32>
    %cst_11 = arith.constant 9.99999974E-6 : f32
    %21 = vector.broadcast %cst_11 : f32 to vector<16x1xf32>
    %22 = arith.addf %18, %21 : vector<16x1xf32>
    %23 = math.rsqrt %22 : vector<16x1xf32>
    %24 = vector.broadcast %23 : vector<16x1xf32> to vector<16x32xf32>
    %25 = arith.mulf %20, %24 : vector<16x32xf32>
    %c0_12 = arith.constant 0 : index
    %c0_13 = arith.constant 0 : index
    %26 = vector.load %arg5[%c0_12, %c0_13] : memref<1x32xf32, #tpu.memory_space<vmem>>, vector<1x32xf32>
    %27 = vector.broadcast %26 : vector<1x32xf32> to vector<16x32xf32>
    %28 = arith.mulf %25, %27 : vector<16x32xf32>
    %c0_14 = arith.constant 0 : index
    %c0_15 = arith.constant 0 : index
    %29 = vector.load %arg6[%c0_14, %c0_15] : memref<1x32xf32, #tpu.memory_space<vmem>>, vector<1x32xf32>
    %30 = vector.broadcast %29 : vector<1x32xf32> to vector<16x32xf32>
    %31 = arith.addf %28, %30 : vector<16x32xf32>
    %c0_16 = arith.constant 0 : index
    %c0_17 = arith.constant 0 : index
    %32 = vector.load %arg7[%c0_16, %c0_17] : memref<16x32xf32, #tpu.memory_space<vmem>>, vector<16x32xf32>
    tpu.vector_store %arg7[%c0_16, %c0_17], %31 {strides = array<i32>} : memref<16x32xf32, #tpu.memory_space<vmem>>, vector<16x32xf32>,
    return
  }
  func.func @transform_0(%arg0: i32) -> (i32, i32) {
    %c0_i32 = arith.constant 0 : i32
    %c0_i32_0 = arith.constant 0 : i32
    return %arg0, %c0_i32 : i32, i32
  }
  func.func @transform_1(%arg0: i32) -> (i32, i32) {
    %c0_i32 = arith.constant 0 : i32
    %c0_i32_0 = arith.constant 0 : i32
    %c0_i32_1 = arith.constant 0 : i32
    return %c0_i32, %c0_i32_0 : i32, i32
  }
  func.func @transform_2(%arg0: i32) -> (i32, i32) {
    %c0_i32 = arith.constant 0 : i32
    %c0_i32_0 = arith.constant 0 : i32
    %c0_i32_1 = arith.constant 0 : i32
    return %c0_i32, %c0_i32_0 : i32, i32
  }
  func.func @transform_3(%arg0: i32) -> (i32, i32) {
    %c0_i32 = arith.constant 0 : i32
    %c0_i32_0 = arith.constant 0 : i32
    return %arg0, %c0_i32 : i32, i32
  }
  func.func @transform_4(%arg0: i32) -> (i32, i32) {
    %c0_i32 = arith.constant 0 : i32
    %c0_i32_0 = arith.constant 0 : i32
    %c0_i32_1 = arith.constant 0 : i32
    return %c0_i32, %c0_i32_0 : i32, i32
  }
  func.func @transform_5(%arg0: i32) -> (i32, i32) {
    %c0_i32 = arith.constant 0 : i32
    %c0_i32_0 = arith.constant 0 : i32
    %c0_i32_1 = arith.constant 0 : i32
    return %c0_i32, %c0_i32_0 : i32, i32
  }
  func.func @transform_6(%arg0: i32) -> (i32, i32) {
    %c0_i32 = arith.constant 0 : i32
    %c0_i32_0 = arith.constant 0 : i32
    return %arg0, %c0_i32 : i32, i32
  }
}

module attributes {stable_mosaic.version = 11 : i64} {
  func.func @_linear_kernel(%arg0: i32, %arg1: memref<16x32xf32, #tpu.memory_space<vmem>>, %arg2: memref<32x96xf32, #tpu.memory_space<vmem>>, %arg3: memref<1x96xf32, #tpu.memory_space<vmem>>, %arg4: memref<16x96xf32, #tpu.memory_space<vmem>>) attributes {dimension_semantics = [#tpu.dimension_semantics<parallel>], iteration_bounds = array<i64: 1>, scalar_prefetch = 0 : i64, scratch_operands = 0 : i64, tpu.core_type = #tpu.core_type<tc>, window_params = [{transform_indices = @transform_0, window_bounds = array<i64: 16, 32>}, {pipeline_mode = #tpu.pipeline_mode<synchronous>, transform_indices = @transform_1, window_bounds = array<i64: 32, 96>}, {pipeline_mode = #tpu.pipeline_mode<synchronous>, transform_indices = @transform_2, window_bounds = array<i64: 1, 96>}, {transform_indices = @transform_3, window_bounds = array<i64: 16, 96>}]} {
    %c0 = arith.constant 0 : index
    %c0_0 = arith.constant 0 : index
    %0 = vector.load %arg1[%c0, %c0_0] : memref<16x32xf32, #tpu.memory_space<vmem>>, vector<16x32xf32>
    %c0_1 = arith.constant 0 : index
    %c0_2 = arith.constant 0 : index
    %1 = vector.load %arg2[%c0_1, %c0_2] : memref<32x96xf32, #tpu.memory_space<vmem>>, vector<32x96xf32>
    %cst = arith.constant dense<0.000000e+00> : vector<16x96xf32>
    %2 = tpu.matmul %0, %1, %cst {dimension_numbers = #tpu.dot_dimension_numbers<[1], [0], [0], [1], [0, 0, 1, 1], [], []>} : vector<16x32xf32>, vector<32x96xf32>, vector<16x96xf32> -> vector<16x96xf32>
    %c0_3 = arith.constant 0 : index
    %c0_4 = arith.constant 0 : index
    %3 = vector.load %arg3[%c0_3, %c0_4] : memref<1x96xf32, #tpu.memory_space<vmem>>, vector<1x96xf32>
    %4 = vector.broadcast %3 : vector<1x96xf32> to vector<16x96xf32>
    %5 = arith.addf %2, %4 : vector<16x96xf32>
    %c0_5 = arith.constant 0 : index
    %c0_6 = arith.constant 0 : index
    %6 = vector.load %arg4[%c0_5, %c0_6] : memref<16x96xf32, #tpu.memory_space<vmem>>, vector<16x96xf32>
    tpu.vector_store %arg4[%c0_5, %c0_6], %5 {strides = array<i32>} : memref<16x96xf32, #tpu.memory_space<vmem>>, vector<16x96xf32>,
    return
  }
  func.func @transform_0(%arg0: i32) -> (i32, i32) {
    %c0_i32 = arith.constant 0 : i32
    %c0_i32_0 = arith.constant 0 : i32
    return %arg0, %c0_i32 : i32, i32
  }
  func.func @transform_1(%arg0: i32) -> (i32, i32) {
    %c0_i32 = arith.constant 0 : i32
    %c0_i32_0 = arith.constant 0 : i32
    %c0_i32_1 = arith.constant 0 : i32
    return %c0_i32, %c0_i32_0 : i32, i32
  }
  func.func @transform_2(%arg0: i32) -> (i32, i32) {
    %c0_i32 = arith.constant 0 : i32
    %c0_i32_0 = arith.constant 0 : i32
    %c0_i32_1 = arith.constant 0 : i32
    return %c0_i32, %c0_i32_0 : i32, i32
  }
  func.func @transform_3(%arg0: i32) -> (i32, i32) {
    %c0_i32 = arith.constant 0 : i32
    %c0_i32_0 = arith.constant 0 : i32
    return %arg0, %c0_i32 : i32, i32
  }
}

module attributes {stable_mosaic.version = 11 : i64} {
  func.func @_self_attn_kernel(%arg0: i32, %arg1: memref<1x8x96xf32, #tpu.memory_space<vmem>>, %arg2: memref<8x8xf32, #tpu.memory_space<vmem>>, %arg3: memref<1x8x32xf32, #tpu.memory_space<vmem>>) attributes {dimension_semantics = [#tpu.dimension_semantics<parallel>], iteration_bounds = array<i64: 2>, scalar_prefetch = 0 : i64, scratch_operands = 0 : i64, tpu.core_type = #tpu.core_type<tc>, window_params = [{transform_indices = @transform_0, window_bounds = array<i64: 1, 8, 96>}, {pipeline_mode = #tpu.pipeline_mode<synchronous>, transform_indices = @transform_1, window_bounds = array<i64: 8, 8>}, {transform_indices = @transform_2, window_bounds = array<i64: 1, 8, 32>}]} {
    %c0 = arith.constant 0 : index
    %c0_0 = arith.constant 0 : index
    %0 = vector.load %arg2[%c0, %c0_0] : memref<8x8xf32, #tpu.memory_space<vmem>>, vector<8x8xf32>
    %c0_1 = arith.constant 0 : index
    %c0_2 = arith.constant 0 : index
    %c0_3 = arith.constant 0 : index
    %1 = vector.load %arg1[%c0_1, %c0_2, %c0_3] : memref<1x8x96xf32, #tpu.memory_space<vmem>>, vector<1x8x8xf32>
    %2 = vector.shape_cast %1 : vector<1x8x8xf32> to vector<8x8xf32>
    %c0_4 = arith.constant 0 : index
    %c0_5 = arith.constant 0 : index
    %c32 = arith.constant 32 : index
    %3 = vector.load %arg1[%c0_4, %c0_5, %c32] : memref<1x8x96xf32, #tpu.memory_space<vmem>>, vector<1x8x8xf32>
    %4 = vector.shape_cast %3 : vector<1x8x8xf32> to vector<8x8xf32>
    %c0_6 = arith.constant 0 : index
    %c0_7 = arith.constant 0 : index
    %c64 = arith.constant 64 : index
    %5 = vector.load %arg1[%c0_6, %c0_7, %c64] : memref<1x8x96xf32, #tpu.memory_space<vmem>>, vector<1x8x8xf32>
    %6 = vector.shape_cast %5 : vector<1x8x8xf32> to vector<8x8xf32>
    %cst = arith.constant dense<0.000000e+00> : vector<8x8xf32>
    %7 = tpu.matmul %2, %4, %cst {dimension_numbers = #tpu.dot_dimension_numbers<[1], [1], [0], [0], [0, 0, 1, 0], [], []>} : vector<8x8xf32>, vector<8x8xf32>, vector<8x8xf32> -> vector<8x8xf32>
    %cst_8 = arith.constant 0.353553385 : f32
    %8 = vector.broadcast %cst_8 : f32 to vector<8x8xf32>
    %9 = arith.mulf %7, %8 : vector<8x8xf32>
    %10 = arith.addf %9, %0 : vector<8x8xf32>
    %cst_9 = arith.constant dense<0xFF800000> : vector<8xf32>
    %11 = vector.multi_reduction <maximumf>, %10, %cst_9 [1] : vector<8x8xf32> to vector<8xf32>
    %12 = vector.shape_cast %11 : vector<8xf32> to vector<8x1xf32>
    %13 = vector.broadcast %12 : vector<8x1xf32> to vector<8x8xf32>
    %14 = arith.subf %10, %13 : vector<8x8xf32>
    %15 = math.exp %14 : vector<8x8xf32>
    %cst_10 = arith.constant dense<0.000000e+00> : vector<8xf32>
    %16 = vector.multi_reduction <add>, %15, %cst_10 [1] : vector<8x8xf32> to vector<8xf32>
    %17 = vector.shape_cast %16 : vector<8xf32> to vector<8x1xf32>
    %18 = tpu.reciprocal %17 {approx = true} : vector<8x1xf32> -> vector<8x1xf32>
    %19 = vector.broadcast %18 : vector<8x1xf32> to vector<8x8xf32>
    %20 = arith.mulf %15, %19 : vector<8x8xf32>
    %cst_11 = arith.constant dense<0.000000e+00> : vector<8x8xf32>
    %21 = tpu.matmul %20, %6, %cst_11 {dimension_numbers = #tpu.dot_dimension_numbers<[1], [0], [0], [1], [0, 0, 1, 1], [], []>} : vector<8x8xf32>, vector<8x8xf32>, vector<8x8xf32> -> vector<8x8xf32>
    %c0_12 = arith.constant 0 : index
    %c0_13 = arith.constant 0 : index
    %c8 = arith.constant 8 : index
    %22 = vector.load %arg1[%c0_12, %c0_13, %c8] : memref<1x8x96xf32, #tpu.memory_space<vmem>>, vector<1x8x8xf32>
    %23 = vector.shape_cast %22 : vector<1x8x8xf32> to vector<8x8xf32>
    %c0_14 = arith.constant 0 : index
    %c0_15 = arith.constant 0 : index
    %c40 = arith.constant 40 : index
    %24 = vector.load %arg1[%c0_14, %c0_15, %c40] : memref<1x8x96xf32, #tpu.memory_space<vmem>>, vector<1x8x8xf32>
    %25 = vector.shape_cast %24 : vector<1x8x8xf32> to vector<8x8xf32>
    %c0_16 = arith.constant 0 : index
    %c0_17 = arith.constant 0 : index
    %c72 = arith.constant 72 : index
    %26 = vector.load %arg1[%c0_16, %c0_17, %c72] : memref<1x8x96xf32, #tpu.memory_space<vmem>>, vector<1x8x8xf32>
    %27 = vector.shape_cast %26 : vector<1x8x8xf32> to vector<8x8xf32>
    %cst_18 = arith.constant dense<0.000000e+00> : vector<8x8xf32>
    %28 = tpu.matmul %23, %25, %cst_18 {dimension_numbers = #tpu.dot_dimension_numbers<[1], [1], [0], [0], [0, 0, 1, 0], [], []>} : vector<8x8xf32>, vector<8x8xf32>, vector<8x8xf32> -> vector<8x8xf32>
    %cst_19 = arith.constant 0.353553385 : f32
    %29 = vector.broadcast %cst_19 : f32 to vector<8x8xf32>
    %30 = arith.mulf %28, %29 : vector<8x8xf32>
    %31 = arith.addf %30, %0 : vector<8x8xf32>
    %cst_20 = arith.constant dense<0xFF800000> : vector<8xf32>
    %32 = vector.multi_reduction <maximumf>, %31, %cst_20 [1] : vector<8x8xf32> to vector<8xf32>
    %33 = vector.shape_cast %32 : vector<8xf32> to vector<8x1xf32>
    %34 = vector.broadcast %33 : vector<8x1xf32> to vector<8x8xf32>
    %35 = arith.subf %31, %34 : vector<8x8xf32>
    %36 = math.exp %35 : vector<8x8xf32>
    %cst_21 = arith.constant dense<0.000000e+00> : vector<8xf32>
    %37 = vector.multi_reduction <add>, %36, %cst_21 [1] : vector<8x8xf32> to vector<8xf32>
    %38 = vector.shape_cast %37 : vector<8xf32> to vector<8x1xf32>
    %39 = tpu.reciprocal %38 {approx = true} : vector<8x1xf32> -> vector<8x1xf32>
    %40 = vector.broadcast %39 : vector<8x1xf32> to vector<8x8xf32>
    %41 = arith.mulf %36, %40 : vector<8x8xf32>
    %cst_22 = arith.constant dense<0.000000e+00> : vector<8x8xf32>
    %42 = tpu.matmul %41, %27, %cst_22 {dimension_numbers = #tpu.dot_dimension_numbers<[1], [0], [0], [1], [0, 0, 1, 1], [], []>} : vector<8x8xf32>, vector<8x8xf32>, vector<8x8xf32> -> vector<8x8xf32>
    %c0_23 = arith.constant 0 : index
    %c0_24 = arith.constant 0 : index
    %c16 = arith.constant 16 : index
    %43 = vector.load %arg1[%c0_23, %c0_24, %c16] : memref<1x8x96xf32, #tpu.memory_space<vmem>>, vector<1x8x8xf32>
    %44 = vector.shape_cast %43 : vector<1x8x8xf32> to vector<8x8xf32>
    %c0_25 = arith.constant 0 : index
    %c0_26 = arith.constant 0 : index
    %c48 = arith.constant 48 : index
    %45 = vector.load %arg1[%c0_25, %c0_26, %c48] : memref<1x8x96xf32, #tpu.memory_space<vmem>>, vector<1x8x8xf32>
    %46 = vector.shape_cast %45 : vector<1x8x8xf32> to vector<8x8xf32>
    %c0_27 = arith.constant 0 : index
    %c0_28 = arith.constant 0 : index
    %c80 = arith.constant 80 : index
    %47 = vector.load %arg1[%c0_27, %c0_28, %c80] : memref<1x8x96xf32, #tpu.memory_space<vmem>>, vector<1x8x8xf32>
    %48 = vector.shape_cast %47 : vector<1x8x8xf32> to vector<8x8xf32>
    %cst_29 = arith.constant dense<0.000000e+00> : vector<8x8xf32>
    %49 = tpu.matmul %44, %46, %cst_29 {dimension_numbers = #tpu.dot_dimension_numbers<[1], [1], [0], [0], [0, 0, 1, 0], [], []>} : vector<8x8xf32>, vector<8x8xf32>, vector<8x8xf32> -> vector<8x8xf32>
    %cst_30 = arith.constant 0.353553385 : f32
    %50 = vector.broadcast %cst_30 : f32 to vector<8x8xf32>
    %51 = arith.mulf %49, %50 : vector<8x8xf32>
    %52 = arith.addf %51, %0 : vector<8x8xf32>
    %cst_31 = arith.constant dense<0xFF800000> : vector<8xf32>
    %53 = vector.multi_reduction <maximumf>, %52, %cst_31 [1] : vector<8x8xf32> to vector<8xf32>
    %54 = vector.shape_cast %53 : vector<8xf32> to vector<8x1xf32>
    %55 = vector.broadcast %54 : vector<8x1xf32> to vector<8x8xf32>
    %56 = arith.subf %52, %55 : vector<8x8xf32>
    %57 = math.exp %56 : vector<8x8xf32>
    %cst_32 = arith.constant dense<0.000000e+00> : vector<8xf32>
    %58 = vector.multi_reduction <add>, %57, %cst_32 [1] : vector<8x8xf32> to vector<8xf32>
    %59 = vector.shape_cast %58 : vector<8xf32> to vector<8x1xf32>
    %60 = tpu.reciprocal %59 {approx = true} : vector<8x1xf32> -> vector<8x1xf32>
    %61 = vector.broadcast %60 : vector<8x1xf32> to vector<8x8xf32>
    %62 = arith.mulf %57, %61 : vector<8x8xf32>
    %cst_33 = arith.constant dense<0.000000e+00> : vector<8x8xf32>
    %63 = tpu.matmul %62, %48, %cst_33 {dimension_numbers = #tpu.dot_dimension_numbers<[1], [0], [0], [1], [0, 0, 1, 1], [], []>} : vector<8x8xf32>, vector<8x8xf32>, vector<8x8xf32> -> vector<8x8xf32>
    %c0_34 = arith.constant 0 : index
    %c0_35 = arith.constant 0 : index
    %c24 = arith.constant 24 : index
    %64 = vector.load %arg1[%c0_34, %c0_35, %c24] : memref<1x8x96xf32, #tpu.memory_space<vmem>>, vector<1x8x8xf32>
    %65 = vector.shape_cast %64 : vector<1x8x8xf32> to vector<8x8xf32>
    %c0_36 = arith.constant 0 : index
    %c0_37 = arith.constant 0 : index
    %c56 = arith.constant 56 : index
    %66 = vector.load %arg1[%c0_36, %c0_37, %c56] : memref<1x8x96xf32, #tpu.memory_space<vmem>>, vector<1x8x8xf32>
    %67 = vector.shape_cast %66 : vector<1x8x8xf32> to vector<8x8xf32>
    %c0_38 = arith.constant 0 : index
    %c0_39 = arith.constant 0 : index
    %c88 = arith.constant 88 : index
    %68 = vector.load %arg1[%c0_38, %c0_39, %c88] : memref<1x8x96xf32, #tpu.memory_space<vmem>>, vector<1x8x8xf32>
    %69 = vector.shape_cast %68 : vector<1x8x8xf32> to vector<8x8xf32>
    %cst_40 = arith.constant dense<0.000000e+00> : vector<8x8xf32>
    %70 = tpu.matmul %65, %67, %cst_40 {dimension_numbers = #tpu.dot_dimension_numbers<[1], [1], [0], [0], [0, 0, 1, 0], [], []>} : vector<8x8xf32>, vector<8x8xf32>, vector<8x8xf32> -> vector<8x8xf32>
    %cst_41 = arith.constant 0.353553385 : f32
    %71 = vector.broadcast %cst_41 : f32 to vector<8x8xf32>
    %72 = arith.mulf %70, %71 : vector<8x8xf32>
    %73 = arith.addf %72, %0 : vector<8x8xf32>
    %cst_42 = arith.constant dense<0xFF800000> : vector<8xf32>
    %74 = vector.multi_reduction <maximumf>, %73, %cst_42 [1] : vector<8x8xf32> to vector<8xf32>
    %75 = vector.shape_cast %74 : vector<8xf32> to vector<8x1xf32>
    %76 = vector.broadcast %75 : vector<8x1xf32> to vector<8x8xf32>
    %77 = arith.subf %73, %76 : vector<8x8xf32>
    %78 = math.exp %77 : vector<8x8xf32>
    %cst_43 = arith.constant dense<0.000000e+00> : vector<8xf32>
    %79 = vector.multi_reduction <add>, %78, %cst_43 [1] : vector<8x8xf32> to vector<8xf32>
    %80 = vector.shape_cast %79 : vector<8xf32> to vector<8x1xf32>
    %81 = tpu.reciprocal %80 {approx = true} : vector<8x1xf32> -> vector<8x1xf32>
    %82 = vector.broadcast %81 : vector<8x1xf32> to vector<8x8xf32>
    %83 = arith.mulf %78, %82 : vector<8x8xf32>
    %cst_44 = arith.constant dense<0.000000e+00> : vector<8x8xf32>
    %84 = tpu.matmul %83, %69, %cst_44 {dimension_numbers = #tpu.dot_dimension_numbers<[1], [0], [0], [1], [0, 0, 1, 1], [], []>} : vector<8x8xf32>, vector<8x8xf32>, vector<8x8xf32> -> vector<8x8xf32>
    %85 = tpu.concatenate %21, %42, %63, %84 in 1 : vector<8x8xf32>, vector<8x8xf32>, vector<8x8xf32>, vector<8x8xf32> -> vector<8x32xf32>
    %c0_45 = arith.constant 0 : index
    %c0_46 = arith.constant 0 : index
    %c0_47 = arith.constant 0 : index
    %86 = vector.load %arg3[%c0_45, %c0_46, %c0_47] : memref<1x8x32xf32, #tpu.memory_space<vmem>>, vector<1x8x32xf32>
    %87 = vector.shape_cast %86 : vector<1x8x32xf32> to vector<8x32xf32>
    %88 = vector.shape_cast %85 : vector<8x32xf32> to vector<1x8x32xf32>
    tpu.vector_store %arg3[%c0_45, %c0_46, %c0_47], %88 {strides = array<i32>} : memref<1x8x32xf32, #tpu.memory_space<vmem>>, vector<1x8x32xf32>,
    return
  }
  func.func @transform_0(%arg0: i32) -> (i32, i32, i32) {
    %c0_i32 = arith.constant 0 : i32
    %c0_i32_0 = arith.constant 0 : i32
    %c0_i32_1 = arith.constant 0 : i32
    return %arg0, %c0_i32, %c0_i32_0 : i32, i32, i32
  }
  func.func @transform_1(%arg0: i32) -> (i32, i32) {
    %c0_i32 = arith.constant 0 : i32
    %c0_i32_0 = arith.constant 0 : i32
    %c0_i32_1 = arith.constant 0 : i32
    return %c0_i32, %c0_i32_0 : i32, i32
  }
  func.func @transform_2(%arg0: i32) -> (i32, i32, i32) {
    %c0_i32 = arith.constant 0 : i32
    %c0_i32_0 = arith.constant 0 : i32
    %c0_i32_1 = arith.constant 0 : i32
    return %arg0, %c0_i32, %c0_i32_0 : i32, i32, i32
  }
}

module attributes {stable_mosaic.version = 11 : i64} {
  func.func @_linear_kernel(%arg0: i32, %arg1: memref<32x32xf32, #tpu.memory_space<vmem>>, %arg2: memref<32x64xf32, #tpu.memory_space<vmem>>, %arg3: memref<1x64xf32, #tpu.memory_space<vmem>>, %arg4: memref<32x64xf32, #tpu.memory_space<vmem>>) attributes {dimension_semantics = [#tpu.dimension_semantics<parallel>], iteration_bounds = array<i64: 1>, scalar_prefetch = 0 : i64, scratch_operands = 0 : i64, tpu.core_type = #tpu.core_type<tc>, window_params = [{transform_indices = @transform_0, window_bounds = array<i64: 32, 32>}, {pipeline_mode = #tpu.pipeline_mode<synchronous>, transform_indices = @transform_1, window_bounds = array<i64: 32, 64>}, {pipeline_mode = #tpu.pipeline_mode<synchronous>, transform_indices = @transform_2, window_bounds = array<i64: 1, 64>}, {transform_indices = @transform_3, window_bounds = array<i64: 32, 64>}]} {
    %c0 = arith.constant 0 : index
    %c0_0 = arith.constant 0 : index
    %0 = vector.load %arg1[%c0, %c0_0] : memref<32x32xf32, #tpu.memory_space<vmem>>, vector<32x32xf32>
    %c0_1 = arith.constant 0 : index
    %c0_2 = arith.constant 0 : index
    %1 = vector.load %arg2[%c0_1, %c0_2] : memref<32x64xf32, #tpu.memory_space<vmem>>, vector<32x64xf32>
    %cst = arith.constant dense<0.000000e+00> : vector<32x64xf32>
    %2 = tpu.matmul %0, %1, %cst {dimension_numbers = #tpu.dot_dimension_numbers<[1], [0], [0], [1], [0, 0, 1, 1], [], []>} : vector<32x32xf32>, vector<32x64xf32>, vector<32x64xf32> -> vector<32x64xf32>
    %c0_3 = arith.constant 0 : index
    %c0_4 = arith.constant 0 : index
    %3 = vector.load %arg3[%c0_3, %c0_4] : memref<1x64xf32, #tpu.memory_space<vmem>>, vector<1x64xf32>
    %4 = vector.broadcast %3 : vector<1x64xf32> to vector<32x64xf32>
    %5 = arith.addf %2, %4 : vector<32x64xf32>
    %c0_5 = arith.constant 0 : index
    %c0_6 = arith.constant 0 : index
    %6 = vector.load %arg4[%c0_5, %c0_6] : memref<32x64xf32, #tpu.memory_space<vmem>>, vector<32x64xf32>
    tpu.vector_store %arg4[%c0_5, %c0_6], %5 {strides = array<i32>} : memref<32x64xf32, #tpu.memory_space<vmem>>, vector<32x64xf32>,
    return
  }
  func.func @transform_0(%arg0: i32) -> (i32, i32) {
    %c0_i32 = arith.constant 0 : i32
    %c0_i32_0 = arith.constant 0 : i32
    return %arg0, %c0_i32 : i32, i32
  }
  func.func @transform_1(%arg0: i32) -> (i32, i32) {
    %c0_i32 = arith.constant 0 : i32
    %c0_i32_0 = arith.constant 0 : i32
    %c0_i32_1 = arith.constant 0 : i32
    return %c0_i32, %c0_i32_0 : i32, i32
  }
  func.func @transform_2(%arg0: i32) -> (i32, i32) {
    %c0_i32 = arith.constant 0 : i32
    %c0_i32_0 = arith.constant 0 : i32
    %c0_i32_1 = arith.constant 0 : i32
    return %c0_i32, %c0_i32_0 : i32, i32
  }
  func.func @transform_3(%arg0: i32) -> (i32, i32) {
    %c0_i32 = arith.constant 0 : i32
    %c0_i32_0 = arith.constant 0 : i32
    return %arg0, %c0_i32 : i32, i32
  }
}

module attributes {stable_mosaic.version = 11 : i64} {
  func.func @_cross_attn_kernel(%arg0: i32, %arg1: memref<1x8x32xf32, #tpu.memory_space<vmem>>, %arg2: memref<1x16x64xf32, #tpu.memory_space<vmem>>, %arg3: memref<1x8x32xf32, #tpu.memory_space<vmem>>) attributes {dimension_semantics = [#tpu.dimension_semantics<parallel>], iteration_bounds = array<i64: 2>, scalar_prefetch = 0 : i64, scratch_operands = 0 : i64, tpu.core_type = #tpu.core_type<tc>, window_params = [{transform_indices = @transform_0, window_bounds = array<i64: 1, 8, 32>}, {transform_indices = @transform_1, window_bounds = array<i64: 1, 16, 64>}, {transform_indices = @transform_2, window_bounds = array<i64: 1, 8, 32>}]} {
    %c0 = arith.constant 0 : index
    %c0_0 = arith.constant 0 : index
    %c0_1 = arith.constant 0 : index
    %0 = vector.load %arg1[%c0, %c0_0, %c0_1] : memref<1x8x32xf32, #tpu.memory_space<vmem>>, vector<1x8x8xf32>
    %1 = vector.shape_cast %0 : vector<1x8x8xf32> to vector<8x8xf32>
    %c0_2 = arith.constant 0 : index
    %c0_3 = arith.constant 0 : index
    %c0_4 = arith.constant 0 : index
    %2 = vector.load %arg2[%c0_2, %c0_3, %c0_4] : memref<1x16x64xf32, #tpu.memory_space<vmem>>, vector<1x16x8xf32>
    %3 = vector.shape_cast %2 : vector<1x16x8xf32> to vector<16x8xf32>
    %c0_5 = arith.constant 0 : index
    %c0_6 = arith.constant 0 : index
    %c32 = arith.constant 32 : index
    %4 = vector.load %arg2[%c0_5, %c0_6, %c32] : memref<1x16x64xf32, #tpu.memory_space<vmem>>, vector<1x16x8xf32>
    %5 = vector.shape_cast %4 : vector<1x16x8xf32> to vector<16x8xf32>
    %cst = arith.constant dense<0.000000e+00> : vector<8x16xf32>
    %6 = tpu.matmul %1, %3, %cst {dimension_numbers = #tpu.dot_dimension_numbers<[1], [1], [0], [0], [0, 0, 1, 0], [], []>} : vector<8x8xf32>, vector<16x8xf32>, vector<8x16xf32> -> vector<8x16xf32>
    %cst_7 = arith.constant 0.353553385 : f32
    %7 = vector.broadcast %cst_7 : f32 to vector<8x16xf32>
    %8 = arith.mulf %6, %7 : vector<8x16xf32>
    %cst_8 = arith.constant dense<0xFF800000> : vector<8xf32>
    %9 = vector.multi_reduction <maximumf>, %8, %cst_8 [1] : vector<8x16xf32> to vector<8xf32>
    %10 = vector.shape_cast %9 : vector<8xf32> to vector<8x1xf32>
    %11 = vector.broadcast %10 : vector<8x1xf32> to vector<8x16xf32>
    %12 = arith.subf %8, %11 : vector<8x16xf32>
    %13 = math.exp %12 : vector<8x16xf32>
    %cst_9 = arith.constant dense<0.000000e+00> : vector<8xf32>
    %14 = vector.multi_reduction <add>, %13, %cst_9 [1] : vector<8x16xf32> to vector<8xf32>
    %15 = vector.shape_cast %14 : vector<8xf32> to vector<8x1xf32>
    %16 = tpu.reciprocal %15 {approx = true} : vector<8x1xf32> -> vector<8x1xf32>
    %17 = vector.broadcast %16 : vector<8x1xf32> to vector<8x16xf32>
    %18 = arith.mulf %13, %17 : vector<8x16xf32>
    %cst_10 = arith.constant dense<0.000000e+00> : vector<8x8xf32>
    %19 = tpu.matmul %18, %5, %cst_10 {dimension_numbers = #tpu.dot_dimension_numbers<[1], [0], [0], [1], [0, 0, 1, 1], [], []>} : vector<8x16xf32>, vector<16x8xf32>, vector<8x8xf32> -> vector<8x8xf32>
    %c0_11 = arith.constant 0 : index
    %c0_12 = arith.constant 0 : index
    %c8 = arith.constant 8 : index
    %20 = vector.load %arg1[%c0_11, %c0_12, %c8] : memref<1x8x32xf32, #tpu.memory_space<vmem>>, vector<1x8x8xf32>
    %21 = vector.shape_cast %20 : vector<1x8x8xf32> to vector<8x8xf32>
    %c0_13 = arith.constant 0 : index
    %c0_14 = arith.constant 0 : index
    %c8_15 = arith.constant 8 : index
    %22 = vector.load %arg2[%c0_13, %c0_14, %c8_15] : memref<1x16x64xf32, #tpu.memory_space<vmem>>, vector<1x16x8xf32>
    %23 = vector.shape_cast %22 : vector<1x16x8xf32> to vector<16x8xf32>
    %c0_16 = arith.constant 0 : index
    %c0_17 = arith.constant 0 : index
    %c40 = arith.constant 40 : index
    %24 = vector.load %arg2[%c0_16, %c0_17, %c40] : memref<1x16x64xf32, #tpu.memory_space<vmem>>, vector<1x16x8xf32>
    %25 = vector.shape_cast %24 : vector<1x16x8xf32> to vector<16x8xf32>
    %cst_18 = arith.constant dense<0.000000e+00> : vector<8x16xf32>
    %26 = tpu.matmul %21, %23, %cst_18 {dimension_numbers = #tpu.dot_dimension_numbers<[1], [1], [0], [0], [0, 0, 1, 0], [], []>} : vector<8x8xf32>, vector<16x8xf32>, vector<8x16xf32> -> vector<8x16xf32>
    %cst_19 = arith.constant 0.353553385 : f32
    %27 = vector.broadcast %cst_19 : f32 to vector<8x16xf32>
    %28 = arith.mulf %26, %27 : vector<8x16xf32>
    %cst_20 = arith.constant dense<0xFF800000> : vector<8xf32>
    %29 = vector.multi_reduction <maximumf>, %28, %cst_20 [1] : vector<8x16xf32> to vector<8xf32>
    %30 = vector.shape_cast %29 : vector<8xf32> to vector<8x1xf32>
    %31 = vector.broadcast %30 : vector<8x1xf32> to vector<8x16xf32>
    %32 = arith.subf %28, %31 : vector<8x16xf32>
    %33 = math.exp %32 : vector<8x16xf32>
    %cst_21 = arith.constant dense<0.000000e+00> : vector<8xf32>
    %34 = vector.multi_reduction <add>, %33, %cst_21 [1] : vector<8x16xf32> to vector<8xf32>
    %35 = vector.shape_cast %34 : vector<8xf32> to vector<8x1xf32>
    %36 = tpu.reciprocal %35 {approx = true} : vector<8x1xf32> -> vector<8x1xf32>
    %37 = vector.broadcast %36 : vector<8x1xf32> to vector<8x16xf32>
    %38 = arith.mulf %33, %37 : vector<8x16xf32>
    %cst_22 = arith.constant dense<0.000000e+00> : vector<8x8xf32>
    %39 = tpu.matmul %38, %25, %cst_22 {dimension_numbers = #tpu.dot_dimension_numbers<[1], [0], [0], [1], [0, 0, 1, 1], [], []>} : vector<8x16xf32>, vector<16x8xf32>, vector<8x8xf32> -> vector<8x8xf32>
    %c0_23 = arith.constant 0 : index
    %c0_24 = arith.constant 0 : index
    %c16 = arith.constant 16 : index
    %40 = vector.load %arg1[%c0_23, %c0_24, %c16] : memref<1x8x32xf32, #tpu.memory_space<vmem>>, vector<1x8x8xf32>
    %41 = vector.shape_cast %40 : vector<1x8x8xf32> to vector<8x8xf32>
    %c0_25 = arith.constant 0 : index
    %c0_26 = arith.constant 0 : index
    %c16_27 = arith.constant 16 : index
    %42 = vector.load %arg2[%c0_25, %c0_26, %c16_27] : memref<1x16x64xf32, #tpu.memory_space<vmem>>, vector<1x16x8xf32>
    %43 = vector.shape_cast %42 : vector<1x16x8xf32> to vector<16x8xf32>
    %c0_28 = arith.constant 0 : index
    %c0_29 = arith.constant 0 : index
    %c48 = arith.constant 48 : index
    %44 = vector.load %arg2[%c0_28, %c0_29, %c48] : memref<1x16x64xf32, #tpu.memory_space<vmem>>, vector<1x16x8xf32>
    %45 = vector.shape_cast %44 : vector<1x16x8xf32> to vector<16x8xf32>
    %cst_30 = arith.constant dense<0.000000e+00> : vector<8x16xf32>
    %46 = tpu.matmul %41, %43, %cst_30 {dimension_numbers = #tpu.dot_dimension_numbers<[1], [1], [0], [0], [0, 0, 1, 0], [], []>} : vector<8x8xf32>, vector<16x8xf32>, vector<8x16xf32> -> vector<8x16xf32>
    %cst_31 = arith.constant 0.353553385 : f32
    %47 = vector.broadcast %cst_31 : f32 to vector<8x16xf32>
    %48 = arith.mulf %46, %47 : vector<8x16xf32>
    %cst_32 = arith.constant dense<0xFF800000> : vector<8xf32>
    %49 = vector.multi_reduction <maximumf>, %48, %cst_32 [1] : vector<8x16xf32> to vector<8xf32>
    %50 = vector.shape_cast %49 : vector<8xf32> to vector<8x1xf32>
    %51 = vector.broadcast %50 : vector<8x1xf32> to vector<8x16xf32>
    %52 = arith.subf %48, %51 : vector<8x16xf32>
    %53 = math.exp %52 : vector<8x16xf32>
    %cst_33 = arith.constant dense<0.000000e+00> : vector<8xf32>
    %54 = vector.multi_reduction <add>, %53, %cst_33 [1] : vector<8x16xf32> to vector<8xf32>
    %55 = vector.shape_cast %54 : vector<8xf32> to vector<8x1xf32>
    %56 = tpu.reciprocal %55 {approx = true} : vector<8x1xf32> -> vector<8x1xf32>
    %57 = vector.broadcast %56 : vector<8x1xf32> to vector<8x16xf32>
    %58 = arith.mulf %53, %57 : vector<8x16xf32>
    %cst_34 = arith.constant dense<0.000000e+00> : vector<8x8xf32>
    %59 = tpu.matmul %58, %45, %cst_34 {dimension_numbers = #tpu.dot_dimension_numbers<[1], [0], [0], [1], [0, 0, 1, 1], [], []>} : vector<8x16xf32>, vector<16x8xf32>, vector<8x8xf32> -> vector<8x8xf32>
    %c0_35 = arith.constant 0 : index
    %c0_36 = arith.constant 0 : index
    %c24 = arith.constant 24 : index
    %60 = vector.load %arg1[%c0_35, %c0_36, %c24] : memref<1x8x32xf32, #tpu.memory_space<vmem>>, vector<1x8x8xf32>
    %61 = vector.shape_cast %60 : vector<1x8x8xf32> to vector<8x8xf32>
    %c0_37 = arith.constant 0 : index
    %c0_38 = arith.constant 0 : index
    %c24_39 = arith.constant 24 : index
    %62 = vector.load %arg2[%c0_37, %c0_38, %c24_39] : memref<1x16x64xf32, #tpu.memory_space<vmem>>, vector<1x16x8xf32>
    %63 = vector.shape_cast %62 : vector<1x16x8xf32> to vector<16x8xf32>
    %c0_40 = arith.constant 0 : index
    %c0_41 = arith.constant 0 : index
    %c56 = arith.constant 56 : index
    %64 = vector.load %arg2[%c0_40, %c0_41, %c56] : memref<1x16x64xf32, #tpu.memory_space<vmem>>, vector<1x16x8xf32>
    %65 = vector.shape_cast %64 : vector<1x16x8xf32> to vector<16x8xf32>
    %cst_42 = arith.constant dense<0.000000e+00> : vector<8x16xf32>
    %66 = tpu.matmul %61, %63, %cst_42 {dimension_numbers = #tpu.dot_dimension_numbers<[1], [1], [0], [0], [0, 0, 1, 0], [], []>} : vector<8x8xf32>, vector<16x8xf32>, vector<8x16xf32> -> vector<8x16xf32>
    %cst_43 = arith.constant 0.353553385 : f32
    %67 = vector.broadcast %cst_43 : f32 to vector<8x16xf32>
    %68 = arith.mulf %66, %67 : vector<8x16xf32>
    %cst_44 = arith.constant dense<0xFF800000> : vector<8xf32>
    %69 = vector.multi_reduction <maximumf>, %68, %cst_44 [1] : vector<8x16xf32> to vector<8xf32>
    %70 = vector.shape_cast %69 : vector<8xf32> to vector<8x1xf32>
    %71 = vector.broadcast %70 : vector<8x1xf32> to vector<8x16xf32>
    %72 = arith.subf %68, %71 : vector<8x16xf32>
    %73 = math.exp %72 : vector<8x16xf32>
    %cst_45 = arith.constant dense<0.000000e+00> : vector<8xf32>
    %74 = vector.multi_reduction <add>, %73, %cst_45 [1] : vector<8x16xf32> to vector<8xf32>
    %75 = vector.shape_cast %74 : vector<8xf32> to vector<8x1xf32>
    %76 = tpu.reciprocal %75 {approx = true} : vector<8x1xf32> -> vector<8x1xf32>
    %77 = vector.broadcast %76 : vector<8x1xf32> to vector<8x16xf32>
    %78 = arith.mulf %73, %77 : vector<8x16xf32>
    %cst_46 = arith.constant dense<0.000000e+00> : vector<8x8xf32>
    %79 = tpu.matmul %78, %65, %cst_46 {dimension_numbers = #tpu.dot_dimension_numbers<[1], [0], [0], [1], [0, 0, 1, 1], [], []>} : vector<8x16xf32>, vector<16x8xf32>, vector<8x8xf32> -> vector<8x8xf32>
    %80 = tpu.concatenate %19, %39, %59, %79 in 1 : vector<8x8xf32>, vector<8x8xf32>, vector<8x8xf32>, vector<8x8xf32> -> vector<8x32xf32>
    %c0_47 = arith.constant 0 : index
    %c0_48 = arith.constant 0 : index
    %c0_49 = arith.constant 0 : index
    %81 = vector.load %arg3[%c0_47, %c0_48, %c0_49] : memref<1x8x32xf32, #tpu.memory_space<vmem>>, vector<1x8x32xf32>
    %82 = vector.shape_cast %81 : vector<1x8x32xf32> to vector<8x32xf32>
    %83 = vector.shape_cast %80 : vector<8x32xf32> to vector<1x8x32xf32>
    tpu.vector_store %arg3[%c0_47, %c0_48, %c0_49], %83 {strides = array<i32>} : memref<1x8x32xf32, #tpu.memory_space<vmem>>, vector<1x8x32xf32>,
    return
  }
  func.func @transform_0(%arg0: i32) -> (i32, i32, i32) {
    %c0_i32 = arith.constant 0 : i32
    %c0_i32_0 = arith.constant 0 : i32
    %c0_i32_1 = arith.constant 0 : i32
    return %arg0, %c0_i32, %c0_i32_0 : i32, i32, i32
  }
  func.func @transform_1(%arg0: i32) -> (i32, i32, i32) {
    %c0_i32 = arith.constant 0 : i32
    %c0_i32_0 = arith.constant 0 : i32
    %c0_i32_1 = arith.constant 0 : i32
    return %arg0, %c0_i32, %c0_i32_0 : i32, i32, i32
  }
  func.func @transform_2(%arg0: i32) -> (i32, i32, i32) {
    %c0_i32 = arith.constant 0 : i32
    %c0_i32_0 = arith.constant 0 : i32
    %c0_i32_1 = arith.constant 0 : i32
    return %arg0, %c0_i32, %c0_i32_0 : i32, i32, i32
  }
}

module attributes {stable_mosaic.version = 11 : i64} {
  func.func @_ffn_ln_kernel(%arg0: i32, %arg1: memref<16x32xf32, #tpu.memory_space<vmem>>, %arg2: memref<32x64xf32, #tpu.memory_space<vmem>>, %arg3: memref<1x64xf32, #tpu.memory_space<vmem>>, %arg4: memref<64x32xf32, #tpu.memory_space<vmem>>, %arg5: memref<1x32xf32, #tpu.memory_space<vmem>>, %arg6: memref<1x32xf32, #tpu.memory_space<vmem>>, %arg7: memref<1x32xf32, #tpu.memory_space<vmem>>, %arg8: memref<16x32xf32, #tpu.memory_space<vmem>>) attributes {dimension_semantics = [#tpu.dimension_semantics<parallel>], iteration_bounds = array<i64: 1>, scalar_prefetch = 0 : i64, scratch_operands = 0 : i64, tpu.core_type = #tpu.core_type<tc>, window_params = [{transform_indices = @transform_0, window_bounds = array<i64: 16, 32>}, {pipeline_mode = #tpu.pipeline_mode<synchronous>, transform_indices = @transform_1, window_bounds = array<i64: 32, 64>}, {pipeline_mode = #tpu.pipeline_mode<synchronous>, transform_indices = @transform_2, window_bounds = array<i64: 1, 64>}, {pipeline_mode = #tpu.pipeline_mode<synchronous>, transform_indices = @transform_3, window_bounds = array<i64: 64, 32>}, {pipeline_mode = #tpu.pipeline_mode<synchronous>, transform_indices = @transform_4, window_bounds = array<i64: 1, 32>}, {pipeline_mode = #tpu.pipeline_mode<synchronous>, transform_indices = @transform_5, window_bounds = array<i64: 1, 32>}, {pipeline_mode = #tpu.pipeline_mode<synchronous>, transform_indices = @transform_6, window_bounds = array<i64: 1, 32>}, {transform_indices = @transform_7, window_bounds = array<i64: 16, 32>}]} {
    %c0 = arith.constant 0 : index
    %c0_0 = arith.constant 0 : index
    %0 = vector.load %arg1[%c0, %c0_0] : memref<16x32xf32, #tpu.memory_space<vmem>>, vector<16x32xf32>
    %c0_1 = arith.constant 0 : index
    %c0_2 = arith.constant 0 : index
    %1 = vector.load %arg2[%c0_1, %c0_2] : memref<32x64xf32, #tpu.memory_space<vmem>>, vector<32x64xf32>
    %cst = arith.constant dense<0.000000e+00> : vector<16x64xf32>
    %2 = tpu.matmul %0, %1, %cst {dimension_numbers = #tpu.dot_dimension_numbers<[1], [0], [0], [1], [0, 0, 1, 1], [], []>} : vector<16x32xf32>, vector<32x64xf32>, vector<16x64xf32> -> vector<16x64xf32>
    %c0_3 = arith.constant 0 : index
    %c0_4 = arith.constant 0 : index
    %3 = vector.load %arg3[%c0_3, %c0_4] : memref<1x64xf32, #tpu.memory_space<vmem>>, vector<1x64xf32>
    %4 = vector.broadcast %3 : vector<1x64xf32> to vector<16x64xf32>
    %5 = arith.addf %2, %4 : vector<16x64xf32>
    %cst_5 = arith.constant 0.000000e+00 : f32
    %6 = vector.broadcast %cst_5 : f32 to vector<16x64xf32>
    %7 = arith.maximumf %5, %6 : vector<16x64xf32>
    %c0_6 = arith.constant 0 : index
    %c0_7 = arith.constant 0 : index
    %8 = vector.load %arg4[%c0_6, %c0_7] : memref<64x32xf32, #tpu.memory_space<vmem>>, vector<64x32xf32>
    %cst_8 = arith.constant dense<0.000000e+00> : vector<16x32xf32>
    %9 = tpu.matmul %7, %8, %cst_8 {dimension_numbers = #tpu.dot_dimension_numbers<[1], [0], [0], [1], [0, 0, 1, 1], [], []>} : vector<16x64xf32>, vector<64x32xf32>, vector<16x32xf32> -> vector<16x32xf32>
    %c0_9 = arith.constant 0 : index
    %c0_10 = arith.constant 0 : index
    %10 = vector.load %arg5[%c0_9, %c0_10] : memref<1x32xf32, #tpu.memory_space<vmem>>, vector<1x32xf32>
    %11 = vector.broadcast %10 : vector<1x32xf32> to vector<16x32xf32>
    %12 = arith.addf %9, %11 : vector<16x32xf32>
    %13 = arith.addf %12, %0 : vector<16x32xf32>
    %cst_11 = arith.constant dense<0.000000e+00> : vector<16xf32>
    %14 = vector.multi_reduction <add>, %13, %cst_11 [1] : vector<16x32xf32> to vector<16xf32>
    %15 = vector.shape_cast %14 : vector<16xf32> to vector<16x1xf32>
    %cst_12 = arith.constant 3.200000e+01 : f32
    %16 = vector.broadcast %cst_12 : f32 to vector<16x1xf32>
    %17 = arith.divf %15, %16 : vector<16x1xf32>
    %18 = vector.broadcast %17 : vector<16x1xf32> to vector<16x32xf32>
    %19 = arith.subf %13, %18 : vector<16x32xf32>
    %20 = arith.mulf %19, %19 : vector<16x32xf32>
    %cst_13 = arith.constant dense<0.000000e+00> : vector<16xf32>
    %21 = vector.multi_reduction <add>, %20, %cst_13 [1] : vector<16x32xf32> to vector<16xf32>
    %22 = vector.shape_cast %21 : vector<16xf32> to vector<16x1xf32>
    %cst_14 = arith.constant 3.200000e+01 : f32
    %23 = vector.broadcast %cst_14 : f32 to vector<16x1xf32>
    %24 = arith.divf %22, %23 : vector<16x1xf32>
    %25 = vector.broadcast %17 : vector<16x1xf32> to vector<16x32xf32>
    %26 = arith.subf %13, %25 : vector<16x32xf32>
    %cst_15 = arith.constant 9.99999974E-6 : f32
    %27 = vector.broadcast %cst_15 : f32 to vector<16x1xf32>
    %28 = arith.addf %24, %27 : vector<16x1xf32>
    %29 = math.rsqrt %28 : vector<16x1xf32>
    %30 = vector.broadcast %29 : vector<16x1xf32> to vector<16x32xf32>
    %31 = arith.mulf %26, %30 : vector<16x32xf32>
    %c0_16 = arith.constant 0 : index
    %c0_17 = arith.constant 0 : index
    %32 = vector.load %arg6[%c0_16, %c0_17] : memref<1x32xf32, #tpu.memory_space<vmem>>, vector<1x32xf32>
    %33 = vector.broadcast %32 : vector<1x32xf32> to vector<16x32xf32>
    %34 = arith.mulf %31, %33 : vector<16x32xf32>
    %c0_18 = arith.constant 0 : index
    %c0_19 = arith.constant 0 : index
    %35 = vector.load %arg7[%c0_18, %c0_19] : memref<1x32xf32, #tpu.memory_space<vmem>>, vector<1x32xf32>
    %36 = vector.broadcast %35 : vector<1x32xf32> to vector<16x32xf32>
    %37 = arith.addf %34, %36 : vector<16x32xf32>
    %c0_20 = arith.constant 0 : index
    %c0_21 = arith.constant 0 : index
    %38 = vector.load %arg8[%c0_20, %c0_21] : memref<16x32xf32, #tpu.memory_space<vmem>>, vector<16x32xf32>
    tpu.vector_store %arg8[%c0_20, %c0_21], %37 {strides = array<i32>} : memref<16x32xf32, #tpu.memory_space<vmem>>, vector<16x32xf32>,
    return
  }
  func.func @transform_0(%arg0: i32) -> (i32, i32) {
    %c0_i32 = arith.constant 0 : i32
    %c0_i32_0 = arith.constant 0 : i32
    return %arg0, %c0_i32 : i32, i32
  }
  func.func @transform_1(%arg0: i32) -> (i32, i32) {
    %c0_i32 = arith.constant 0 : i32
    %c0_i32_0 = arith.constant 0 : i32
    %c0_i32_1 = arith.constant 0 : i32
    return %c0_i32, %c0_i32_0 : i32, i32
  }
  func.func @transform_2(%arg0: i32) -> (i32, i32) {
    %c0_i32 = arith.constant 0 : i32
    %c0_i32_0 = arith.constant 0 : i32
    %c0_i32_1 = arith.constant 0 : i32
    return %c0_i32, %c0_i32_0 : i32, i32
  }
  func.func @transform_3(%arg0: i32) -> (i32, i32) {
    %c0_i32 = arith.constant 0 : i32
    %c0_i32_0 = arith.constant 0 : i32
    %c0_i32_1 = arith.constant 0 : i32
    return %c0_i32, %c0_i32_0 : i32, i32
  }
  func.func @transform_4(%arg0: i32) -> (i32, i32) {
    %c0_i32 = arith.constant 0 : i32
    %c0_i32_0 = arith.constant 0 : i32
    %c0_i32_1 = arith.constant 0 : i32
    return %c0_i32, %c0_i32_0 : i32, i32
  }
  func.func @transform_5(%arg0: i32) -> (i32, i32) {
    %c0_i32 = arith.constant 0 : i32
    %c0_i32_0 = arith.constant 0 : i32
    %c0_i32_1 = arith.constant 0 : i32
    return %c0_i32, %c0_i32_0 : i32, i32
  }
  func.func @transform_6(%arg0: i32) -> (i32, i32) {
    %c0_i32 = arith.constant 0 : i32
    %c0_i32_0 = arith.constant 0 : i32
    %c0_i32_1 = arith.constant 0 : i32
    return %c0_i32, %c0_i32_0 : i32, i32
  }
  func.func @transform_7(%arg0: i32) -> (i32, i32) {
    %c0_i32 = arith.constant 0 : i32
    %c0_i32_0 = arith.constant 0 : i32
    return %arg0, %c0_i32 : i32, i32
  }
}

module attributes {stable_mosaic.version = 11 : i64} {
  func.func @_ln_linear_kernel(%arg0: i32, %arg1: i32, %arg2: memref<16x32xf32, #tpu.memory_space<vmem>>, %arg3: memref<1x32xf32, #tpu.memory_space<vmem>>, %arg4: memref<1x32xf32, #tpu.memory_space<vmem>>, %arg5: memref<32x64xf32, #tpu.memory_space<vmem>>, %arg6: memref<1x64xf32, #tpu.memory_space<vmem>>, %arg7: memref<16x64xf32, #tpu.memory_space<vmem>>) attributes {dimension_semantics = [#tpu.dimension_semantics<parallel>, #tpu.dimension_semantics<parallel>], iteration_bounds = array<i64: 1, 1>, scalar_prefetch = 0 : i64, scratch_operands = 0 : i64, tpu.core_type = #tpu.core_type<tc>, window_params = [{transform_indices = @transform_0, window_bounds = array<i64: 16, 32>}, {pipeline_mode = #tpu.pipeline_mode<synchronous>, transform_indices = @transform_1, window_bounds = array<i64: 1, 32>}, {pipeline_mode = #tpu.pipeline_mode<synchronous>, transform_indices = @transform_2, window_bounds = array<i64: 1, 32>}, {transform_indices = @transform_3, window_bounds = array<i64: 32, 64>}, {transform_indices = @transform_4, window_bounds = array<i64: 1, 64>}, {transform_indices = @transform_5, window_bounds = array<i64: 16, 64>}]} {
    %c0 = arith.constant 0 : index
    %c0_0 = arith.constant 0 : index
    %0 = vector.load %arg2[%c0, %c0_0] : memref<16x32xf32, #tpu.memory_space<vmem>>, vector<16x32xf32>
    %cst = arith.constant dense<0.000000e+00> : vector<16xf32>
    %1 = vector.multi_reduction <add>, %0, %cst [1] : vector<16x32xf32> to vector<16xf32>
    %2 = vector.shape_cast %1 : vector<16xf32> to vector<16x1xf32>
    %cst_1 = arith.constant 3.200000e+01 : f32
    %3 = vector.broadcast %cst_1 : f32 to vector<16x1xf32>
    %4 = arith.divf %2, %3 : vector<16x1xf32>
    %5 = vector.broadcast %4 : vector<16x1xf32> to vector<16x32xf32>
    %6 = arith.subf %0, %5 : vector<16x32xf32>
    %7 = arith.mulf %6, %6 : vector<16x32xf32>
    %cst_2 = arith.constant dense<0.000000e+00> : vector<16xf32>
    %8 = vector.multi_reduction <add>, %7, %cst_2 [1] : vector<16x32xf32> to vector<16xf32>
    %9 = vector.shape_cast %8 : vector<16xf32> to vector<16x1xf32>
    %cst_3 = arith.constant 3.200000e+01 : f32
    %10 = vector.broadcast %cst_3 : f32 to vector<16x1xf32>
    %11 = arith.divf %9, %10 : vector<16x1xf32>
    %12 = vector.broadcast %4 : vector<16x1xf32> to vector<16x32xf32>
    %13 = arith.subf %0, %12 : vector<16x32xf32>
    %cst_4 = arith.constant 9.99999974E-6 : f32
    %14 = vector.broadcast %cst_4 : f32 to vector<16x1xf32>
    %15 = arith.addf %11, %14 : vector<16x1xf32>
    %16 = math.rsqrt %15 : vector<16x1xf32>
    %17 = vector.broadcast %16 : vector<16x1xf32> to vector<16x32xf32>
    %18 = arith.mulf %13, %17 : vector<16x32xf32>
    %c0_5 = arith.constant 0 : index
    %c0_6 = arith.constant 0 : index
    %19 = vector.load %arg3[%c0_5, %c0_6] : memref<1x32xf32, #tpu.memory_space<vmem>>, vector<1x32xf32>
    %20 = vector.broadcast %19 : vector<1x32xf32> to vector<16x32xf32>
    %21 = arith.mulf %18, %20 : vector<16x32xf32>
    %c0_7 = arith.constant 0 : index
    %c0_8 = arith.constant 0 : index
    %22 = vector.load %arg4[%c0_7, %c0_8] : memref<1x32xf32, #tpu.memory_space<vmem>>, vector<1x32xf32>
    %23 = vector.broadcast %22 : vector<1x32xf32> to vector<16x32xf32>
    %24 = arith.addf %21, %23 : vector<16x32xf32>
    %c0_9 = arith.constant 0 : index
    %c0_10 = arith.constant 0 : index
    %25 = vector.load %arg5[%c0_9, %c0_10] : memref<32x64xf32, #tpu.memory_space<vmem>>, vector<32x64xf32>
    %cst_11 = arith.constant dense<0.000000e+00> : vector<16x64xf32>
    %26 = tpu.matmul %24, %25, %cst_11 {dimension_numbers = #tpu.dot_dimension_numbers<[1], [0], [0], [1], [0, 0, 1, 1], [], []>} : vector<16x32xf32>, vector<32x64xf32>, vector<16x64xf32> -> vector<16x64xf32>
    %c0_12 = arith.constant 0 : index
    %c0_13 = arith.constant 0 : index
    %27 = vector.load %arg6[%c0_12, %c0_13] : memref<1x64xf32, #tpu.memory_space<vmem>>, vector<1x64xf32>
    %28 = vector.broadcast %27 : vector<1x64xf32> to vector<16x64xf32>
    %29 = arith.addf %26, %28 : vector<16x64xf32>
    %c0_14 = arith.constant 0 : index
    %c0_15 = arith.constant 0 : index
    %30 = vector.load %arg7[%c0_14, %c0_15] : memref<16x64xf32, #tpu.memory_space<vmem>>, vector<16x64xf32>
    tpu.vector_store %arg7[%c0_14, %c0_15], %29 {strides = array<i32>} : memref<16x64xf32, #tpu.memory_space<vmem>>, vector<16x64xf32>,
    return
  }
  func.func @transform_0(%arg0: i32, %arg1: i32) -> (i32, i32) {
    %c0_i32 = arith.constant 0 : i32
    %c0_i32_0 = arith.constant 0 : i32
    return %arg0, %c0_i32 : i32, i32
  }
  func.func @transform_1(%arg0: i32, %arg1: i32) -> (i32, i32) {
    %c0_i32 = arith.constant 0 : i32
    %c0_i32_0 = arith.constant 0 : i32
    %c0_i32_1 = arith.constant 0 : i32
    return %c0_i32, %c0_i32_0 : i32, i32
  }
  func.func @transform_2(%arg0: i32, %arg1: i32) -> (i32, i32) {
    %c0_i32 = arith.constant 0 : i32
    %c0_i32_0 = arith.constant 0 : i32
    %c0_i32_1 = arith.constant 0 : i32
    return %c0_i32, %c0_i32_0 : i32, i32
  }
  func.func @transform_3(%arg0: i32, %arg1: i32) -> (i32, i32) {
    %c0_i32 = arith.constant 0 : i32
    %c0_i32_0 = arith.constant 0 : i32
    return %c0_i32, %arg1 : i32, i32
  }
  func.func @transform_4(%arg0: i32, %arg1: i32) -> (i32, i32) {
    %c0_i32 = arith.constant 0 : i32
    %c0_i32_0 = arith.constant 0 : i32
    return %c0_i32, %arg1 : i32, i32
  }
  func.func @transform_5(%arg0: i32, %arg1: i32) -> (i32, i32) {
    %c0_i32 = arith.constant 0 : i32
    return %arg0, %arg1 : i32, i32
  }
}

</mosaic_0001>

<bundles_post_ra>
// kernel: _lambda_.19
= control target key start
LH: loop header
LB: loop body
LE: loop exit
PB: predicated region body
PF: predicated region fallthrough
CT: control target
= control target key end

     0   :  { %vm36_vm0 = vcmask 261120   ;;  %s289_s1 = inlined_call_operand.vmem [shape: f32[32,32], index: 1, kind: input, shape index: {}]   ;;  %s290_s0 = inlined_call_operand.vmem [shape: f32[16,32], index: 0, kind: input, shape index: {}]   ;;  %s291_s2 = inlined_call_operand.vmem [shape: f32[1,32], index: 2, kind: input, shape index: {}]   ;;  %s292_s3 = inlined_call_operand.vmem [shape: f32[16,32], index: 3, kind: input, shape index: {}]   ;;  %s293_s4 = inlined_call_operand.vmem [shape: f32[1,32], index: 4, kind: input, shape index: {}]   ;;  %s294_s5 = inlined_call_operand.vmem [shape: f32[1,32], index: 5, kind: input, shape index: {}]   ;;  %s295_s6 = inlined_call_operand.vmem [shape: f32[16,32], index: 6, kind: output, shape index: {}]  }
   0x1   :  { %v25_v0 = vld [vmem:[%s289_s1] sm:$0xff]  ;;  %v26_v1 = vld [vmem:[%s289_s1 + $0x8] sm:$0xff]  ;;  %v27_v2 = vld [vmem:[%s289_s1 + $0x10] sm:$0xff] }
   0x2   :  { %v195_v3 = vpack.c.bf16 %v26_v1, %v25_v0  ;;  %v28_v4 = vld [vmem:[%s289_s1 + $0x18] sm:$0xff]  ;;  %v23_v5 = vld [vmem:[%s290_s0] sm:$0xff]  ;;  %v24_v7 = vld [vmem:[%s290_s0 + $0x8] sm:$0xff] }
   0x3   :  { %v199_v6 = vpack.c.bf16 %v28_v4, %v27_v2  ;;  %192 = vmatprep.mubr.msk.f32.mxu0 %vm36_vm0, %v23_v5  ;;  %v173_v8 = vld [vmem:[%s291_s2] ss:$0 sm:$0xff]  ;;  %v119_v14 = vld [vmem:[%s292_s3 + $0x8] sm:$0xff] }
   0x4   :  { %196 = vmatprep.subr.bf16.mxu0 %v195_v3  ;;  %v118_v11 = vld [vmem:[%s292_s3] sm:$0xff] }
   0x5   :  { %198 = vmatpush3.bf16.msra.mxu0 %v195_v3  ;;  %v176_v36 = vld [vmem:[%s293_s4] ss:$0 sm:$0xff] }
   0x6   :  { %200 = vmatprep.subr.bf16.mxu0 %v199_v6  ;;  %v177_v38 = vld [vmem:[%s294_s5] ss:$0 sm:$0xff] }
   0x9   :  { %202 = vmatpush3.bf16.msra.mxu0 %v199_v6 }
   0xc   :  { %193 = vmatmul.mubr.msk.f32.vlgmr.msra.gmra.mrb[0].mxu0 %vm36_vm0, %v24_v7 }
  0xdf   :  { %v194_v9 = vpop.f32.mrb[0].mxu0 }
  0xe0   :  { %v109_v10 = vpop.f32.mrb[1].mxu0  ;;  %v115_v12 = vadd.f32 %v194_v9, %v173_v8 }
  0xe1   :  { %v110_v13 = vadd.f32 %v173_v8, %v109_v10 }
  0xe2   :  { %v121_v17 = vadd.f32 %v119_v14, %v115_v12 }
  0xe3   :  { %v120_v15 = vadd.f32 %v118_v11, %v110_v13 }
  0xe4   :  { %v125_v18 = vsel %vm36_vm0, %v121_v17, 0.0 }
  0xe5   :  { %v122_v16 = vsel %vm36_vm0, %v120_v15, 0.0 }
  0xe6   :  { %123 = vadd.xlane.f32.xlu0 %v122_v16 }
  0xea   :  { %126 = vadd.xlane.f32.xlu0 %v125_v18 }
 0x173   :  { %v124_v19 = vpop.xlane.xlu0 %123 }
 0x174   :  { %v129_v20 = vmul.f32 0.03125, %v124_v19 }
 0x176   :  { %v131_v21 = vsub.f32 %v120_v15, %v129_v20 }
 0x177   :  { %v127_v22 = vpop.xlane.xlu0 %126 }
 0x178   :  { %v130_v23 = vmul.f32 0.03125, %v127_v22  ;;  %v133_v24 = vmul.f32 %v131_v21, %v131_v21 }
 0x17a   :  { %v132_v25 = vsub.f32 %v121_v17, %v130_v23  ;;  %v135_v26 = vsel %vm36_vm0, %v133_v24, 0.0 }
 0x17b   :  { %136 = vadd.xlane.f32.xlu1 %v135_v26 }
 0x17c   :  { %v134_v27 = vmul.f32 %v132_v25, %v132_v25 }
 0x17e   :  { %v138_v28 = vsel %vm36_vm0, %v134_v27, 0.0 }
 0x17f   :  { %139 = vadd.xlane.f32.xlu1 %v138_v28 }
 0x208   :  { %v137_v29 = vpop.xlane.xlu1 %136 }
 0x209   :  { %v141_v30 = vmul.f32 0.03125, %v137_v29 }
 0x20b   :  { %v143_v31 = vadd.f32 1e-05, %v141_v30 }
 0x20c   :  { %v140_v32 = vpop.xlane.xlu1 %139 }
 0x20d   :  { %203 = vrsqrt.f32 %v143_v31  ;;  %v142_v33 = vmul.f32 0.03125, %v140_v32 }
 0x20f   :  { %v144_v34 = vadd.f32 1e-05, %v142_v33 }
 0x211   :  { %205 = vrsqrt.f32 %v144_v34 }
 0x217   :  { %v204_v35 = vpop.eup %203 }
 0x218   :  { %v147_v37 = vmul.f32 %v204_v35, %v131_v21 }
 0x21a   :  { %v156_v39 = vmul.f32 %v176_v36, %v147_v37 }
 0x21b   :  { %v206_v40 = vpop.eup %205 }
 0x21c   :  { %v165_v41 = vadd.f32 %v177_v38, %v156_v39  ;;  %v148_v42 = vmul.f32 %v206_v40, %v132_v25 }
 0x21e   :  { %167 = vst.msk [vmem:[%s295_s6] sm:$0xff] %vm36_vm0, %v165_v41  ;;  %v157_v43 = vmul.f32 %v176_v36, %v148_v42 }
 0x220   :  { %v166_v44 = vadd.f32 %v177_v38, %v157_v43 }
 0x222   :  { %168 = vst.msk [vmem:[%s295_s6 + $0x8] sm:$0xff] %vm36_vm0, %v166_v44 }

// kernel: _lambda_.20
= control target key start
LH: loop header
LB: loop body
LE: loop exit
PB: predicated region body
PF: predicated region fallthrough
CT: control target
= control target key end

     0   :  { %vm27_vm0 = vcmask 261120   ;;  %s194_s1 = inlined_call_operand.vmem [shape: f32[32,32], index: 1, kind: input, shape index: {}]   ;;  %s195_s0 = inlined_call_operand.vmem [shape: f32[16,32], index: 0, kind: input, shape index: {}]   ;;  %s196_s2 = inlined_call_operand.vmem [shape: f32[1,32], index: 2, kind: input, shape index: {}]   ;;  %s197_s3 = inlined_call_operand.vmem [shape: f32[16,32], index: 3, kind: output, shape index: {}]  }
   0x1   :  { %v16_v0 = vld [vmem:[%s194_s1] sm:$0xff]  ;;  %v17_v1 = vld [vmem:[%s194_s1 + $0x8] sm:$0xff]  ;;  %v18_v2 = vld [vmem:[%s194_s1 + $0x10] sm:$0xff] }
   0x2   :  { %v135_v3 = vpack.c.bf16 %v17_v1, %v16_v0  ;;  %v19_v4 = vld [vmem:[%s194_s1 + $0x18] sm:$0xff]  ;;  %v14_v5 = vld [vmem:[%s195_s0] sm:$0xff]  ;;  %v15_v7 = vld [vmem:[%s195_s0 + $0x8] sm:$0xff] }
   0x3   :  { %v139_v6 = vpack.c.bf16 %v19_v4, %v18_v2  ;;  %132 = vmatprep.mubr.msk.f32.mxu0 %vm27_vm0, %v14_v5  ;;  %v115_v8 = vld [vmem:[%s196_s2] ss:$0 sm:$0xff] }
   0x4   :  { %136 = vmatprep.subr.bf16.mxu0 %v135_v3 }
   0x5   :  { %138 = vmatpush3.bf16.msra.mxu0 %v135_v3 }
   0x6   :  { %140 = vmatprep.subr.bf16.mxu0 %v139_v6 }
   0x9   :  { %142 = vmatpush3.bf16.msra.mxu0 %v139_v6 }
   0xc   :  { %133 = vmatmul.mubr.msk.f32.vlgmr.msra.gmra.mrb[0].mxu0 %vm27_vm0, %v15_v7 }
  0xdf   :  { %v134_v9 = vpop.f32.mrb[0].mxu0 }
  0xe0   :  { %v106_v10 = vadd.f32 %v134_v9, %v115_v8  ;;  %v100_v11 = vpop.f32.mrb[1].mxu0 }
  0xe1   :  { %v101_v12 = vadd.f32 %v115_v8, %v100_v11 }
  0xe2   :  { %110 = vst.msk [vmem:[%s197_s3 + $0x8] sm:$0xff] %vm27_vm0, %v106_v10 }
  0xe3   :  { %109 = vst.msk [vmem:[%s197_s3] sm:$0xff] %vm27_vm0, %v101_v12 }

// kernel: _lambda_.17
= control target key start
LH: loop header
LB: loop body
LE: loop exit
PB: predicated region body
PF: predicated region fallthrough
CT: control target
= control target key end

     0   :  { %vm27_vm0 = vcmask 261120   ;;  %vm109_vm1 = vcmask 785408   ;;  %s191_s1 = inlined_call_operand.vmem [shape: f32[32,96], index: 1, kind: input, shape index: {}]   ;;  %s192_s0 = inlined_call_operand.vmem [shape: f32[16,32], index: 0, kind: input, shape index: {}]   ;;  %s193_s2 = inlined_call_operand.vmem [shape: f32[1,96], index: 2, kind: input, shape index: {}]   ;;  %s194_s3 = inlined_call_operand.vmem [shape: f32[16,96], index: 3, kind: output, shape index: {}]  }
   0x1   :  { %v16_v0 = vld [vmem:[%s191_s1] sm:$0xff]  ;;  %v17_v1 = vld [vmem:[%s191_s1 + $0x8] sm:$0xff]  ;;  %v18_v2 = vld [vmem:[%s191_s1 + $0x10] sm:$0xff] }
   0x2   :  { %v136_v3 = vpack.c.bf16 %v17_v1, %v16_v0  ;;  %v19_v4 = vld [vmem:[%s191_s1 + $0x18] sm:$0xff]  ;;  %v14_v5 = vld [vmem:[%s192_s0] sm:$0xff]  ;;  %v15_v7 = vld [vmem:[%s192_s0 + $0x8] sm:$0xff] }
   0x3   :  { %v140_v6 = vpack.c.bf16 %v19_v4, %v18_v2  ;;  %133 = vmatprep.mubr.msk.f32.mxu0 %vm27_vm0, %v14_v5  ;;  %v116_v8 = vld [vmem:[%s193_s2] ss:$0 sm:$0xff] }
   0x4   :  { %137 = vmatprep.subr.bf16.mxu0 %v136_v3 }
   0x5   :  { %139 = vmatpush3.bf16.msra.mxu0 %v136_v3 }
   0x6   :  { %141 = vmatprep.subr.bf16.mxu0 %v140_v6 }
   0x9   :  { %143 = vmatpush3.bf16.msra.mxu0 %v140_v6 }
   0xc   :  { %134 = vmatmul.mubr.msk.f32.vlgmr.msra.gmra.mrb[0].mxu0 %vm27_vm0, %v15_v7 }
  0xdf   :  { %v135_v9 = vpop.f32.mrb[0].mxu0 }
  0xe0   :  { %v106_v10 = vadd.f32 %v135_v9, %v116_v8  ;;  %v100_v11 = vpop.f32.mrb[1].mxu0 }
  0xe1   :  { %v101_v12 = vadd.f32 %v116_v8, %v100_v11 }
  0xe2   :  { %111 = vst.msk [vmem:[%s194_s3 + $0x8] sm:$0xff] %vm109_vm1, %v106_v10 }
  0xe3   :  { %110 = vst.msk [vmem:[%s194_s3] sm:$0xff] %vm109_vm1, %v101_v12 }

// kernel: _lambda_.18
= control target key start
LH: loop header
LB: loop body
LE: loop exit
PB: predicated region body
PF: predicated region fallthrough
CT: control target
= control target key end

     0   :  { %s1037_s9 = smov 0   ;;  %s1126_s0 = inlined_call_operand.vmem [shape: f32[2,8,96], index: 0, kind: input, shape index: {}]   ;;  %s1127_s1 = inlined_call_operand.vmem [shape: f32[8,8], index: 1, kind: input, shape index: {}]   ;;  %s1128_s2 = inlined_call_operand.vmem [shape: f32[2,8,32], index: 2, kind: output, shape index: {}]  }
   0x1 LB: > { %s881_s10 = sadd.s32 4294967295, %s1004_s9   ;;  %p885_p0 = scmp.ge.s32.totalorder %s1004_s9, 1  ;;  %s1004_s9 = sphi %s1037_s9, %s12_s9  }
   0x2   : > { %p111_p1 = scmp.lt.s32.totalorder %s1004_s9, 3 }
   0x4   : > { %p112_p2 = pnand %p885_p0, %p111_p1 }
   0x5   : > { %p131_p3 = scmp.lt.s32.totalorder (!%p112_p2), %s881_s10, 1  ;;  %v1006_v0 = vmov (!%p112_p2), 0.0   ;;  %vm1007_vm0 = vmmov (!%p112_p2), 0   ;;  %s1008_s15 = smov (!%p112_p2), 96   ;;  %vm144_vm1 = vcmask (!%p112_p2), 64512   ;;  %v139_v4 = vld [vmem:[%s1127_s1] sm:$0xff] (!%p112_p2) }
   0x6   : > { %115 = sbr.rel (%p112_p2) target bundleno = 1536 (0x600), region = 28  ;;  %918 = vmatprep.subr.mxu0 (!%p112_p2), %v1006_v0  ;;  %920 = vmatprep.mubr.msk.f32.mxu0 (!%p112_p2), %vm1007_vm0, %v1006_v0  ;;  %s1009_s16 = smov (!%p112_p2), 64   ;;  %vm822_vm2 = vcmask (!%p112_p2), 130048   ;;  %vm824_vm3 = vcmask (!%p112_p2), 195584   ;;  %vm826_vm4 = vcmask (!%p112_p2), 261120  }
   0x7   : > { %923 = vmatprep.subr.mxu1 (!%p112_p2), %v1006_v0  ;;  %925 = vmatprep.mubr.msk.f32.mxu1 (!%p112_p2), %vm1007_vm0, %v1006_v0  ;;  %s1010_s17 = smov (!%p112_p2), 88   ;;  %s1011_s18 = smov (!%p112_p2), 120  }
   0x8   : > { %s1012_s19 = smov (!%p112_p2), 80   ;;  %s1013_s22 = smov (!%p112_p2), 72  }
   0x9   : > { %s1014_s23 = smov (!%p112_p2), 112   ;;  %s1015_s24 = smov (!%p112_p2), 104  }
   0xa   : > { %s1016_s25 = smov (!%p112_p2), 56   ;;  %s1017_s26 = smov (!%p112_p2), 40  }
   0xb   : > { %s1018_s27 = smov (!%p112_p2), 48   ;;  %s1019_s28 = smov (!%p112_p2), 8  }
   0xc   : > { %s1020_s29 = smov (!%p112_p2), 16   ;;  %s1021_s30 = smov (!%p112_p2), 24  }
   0xd   : > { %s1130_s10 = smov (!%p131_p3, %s881_s10), 1 }
   0xe   : > { %s886_s11 = sshll.u32 %s1130_s10, 3 }
   0xf   : > { %s134_s14 = scalar_lea.vmem %s1126_s0, %s886_s11  ;;  %s138_s5 = scalar_lea.vmem %s1128_s2, %s886_s11 }
  0x10   : > { %v1059_v1 = vld [vmem:[%s134_s14] sm:$0xff] }
  0x11   : > { %142 = vrot.lane.b32.xlu0 %v1059_v1, %s1008_s15  ;;  %232 = vrot.lane.b32.xlu1 %v1059_v1, %s1009_s16 }
  0x15   : > { %310 = vrot.lane.b32.xlu1 %v1059_v1, %s1010_s17 }
  0x19   : > { %308 = vrot.lane.b32.xlu1 %v1059_v1, %s1011_s18 }
  0x1d   : > { %477 = vrot.lane.b32.xlu1 %v1059_v1, %s1012_s19 }
  0x83   : > { %v143_v2 = vpop.permute.xlu0 %142  ;;  %v233_v9 = vpop.permute.xlu1 %232 }
  0x84   : > { %919 = vmatpush3.xpose.msk.msra.mxu0 %vm144_vm1, %v143_v2  ;;  %924 = vmatpush3.msra.mxu1 %v233_v9 }
  0x85   : > { %933 = vmatprep.subr.mxu0 %v1006_v0  ;;  %928 = vmatprep.subr.mxu1 %v1006_v0 }
  0x87   : > { %921 = vmatmul.mubr.msk.f32.vlgmr.msra.gmra.mrb[0].mxu0 %vm144_vm1, %v1059_v1  ;;  %v311_v15 = vpop.permute.xlu1 %310 }
  0x88   : > { %935 = vmatprep.mubr.msk.f32.mxu0 %vm1007_vm0, %v1006_v0 }
  0x8b   : > { %v309_v16 = vpop.permute.xlu1 %308 }
  0x8f   : > { %v478_v17 = vpop.permute.xlu1 %477 }
 0x15a   : > { %v215_v3 = vpop.f32.mrb[0].mxu0 }
 0x15b   : > { %v219_v5 = vmul.f32 0.35355338, %v215_v3  ;;  %v922_v6 = vpop.f32.mrb[1].mxu0 }
 0x15d   : > { %v220_v7 = vadd.f32 %v219_v5, %v139_v4 }
 0x15f   : > { %v221_v8 = vsel %vm144_vm1, %v220_v7, -inf }
 0x160   : > { %222 = vmax.xlane.f32.xlu0 %v221_v8 }
 0x176   : > { %644 = vrot.lane.b32.xlu0 %v1059_v1, %s1013_s22 }
 0x1ed   : > { %v223_v10 = vpop.xlane.xlu0 %222 }
 0x1ee   : > { %v224_v11 = vsub.f32 %v220_v7, %v223_v10 }
 0x1f0   : > { %v225_v12 = vmul.f32 1.442695, %v224_v11 }
 0x1f1   : > { %v645_v22 = vpop.permute.xlu0 %644 }
 0x1f2   : > { %982 = vpow2.f32 %v225_v12 }
 0x1fc   : > { %v983_v13 = vpop.eup %982 }
 0x1fd   : > { %v227_v14 = vsel %vm144_vm1, %v983_v13, 0.0 }
 0x1fe   : > { %228 = vadd.xlane.f32.xlu1 %v227_v14 }
 0x20f   : > { %475 = vrot.lane.b32.xlu1 %v1059_v1, %s1014_s23 }
 0x213   : > { %642 = vrot.lane.b32.xlu1 %v1059_v1, %s1015_s24 }
 0x28b   : > { %v229_v18 = vpop.xlane.xlu1 %228 }
 0x28c   : > { %984 = vrcp.f32 %v229_v18 }
 0x28f   : > { %v476_v21 = vpop.permute.xlu1 %475 }
 0x293   : > { %v643_v23 = vpop.permute.xlu1 %642 }
 0x296   : > { %v985_v19 = vpop.eup %984 }
 0x297   : > { %v231_v20 = vmul.f32 %v985_v19, %v983_v13 }
 0x299   : > { %926 = vmatmul.mubr.msk.f32.vlgmr.msra.gmra.mrb[0].mxu1 %vm144_vm1, %v231_v20 }
 0x29a   : > { %929 = vmatpush3.xpose.msk.msra.mxu1 %vm144_vm1, %v311_v15  ;;  %930 = vmatprep.mubr.msk.f32.mxu1 %vm1007_vm0, %v1006_v0 }
 0x29b   : > { %938 = vmatprep.subr.mxu1 %v1006_v0 }
 0x29d   : > { %931 = vmatmul.mubr.msk.f32.vlgmr.msra.gmra.mrb[2].mxu1 %vm144_vm1, %v309_v16 }
 0x29e   : > { %939 = vmatpush3.xpose.msk.msra.mxu1 %vm144_vm1, %v478_v17  ;;  %940 = vmatprep.mubr.msk.f32.mxu1 %vm1007_vm0, %v1006_v0 }
 0x29f   : > { %948 = vmatprep.subr.mxu1 %v1006_v0 }
 0x2a1   : > { %941 = vmatmul.mubr.msk.f32.vlgmr.msra.gmra.mrb[4].mxu1 %vm144_vm1, %v476_v21 }
 0x2a2   : > { %949 = vmatpush3.xpose.msk.msra.mxu1 %vm144_vm1, %v645_v22  ;;  %950 = vmatprep.mubr.msk.f32.mxu1 %vm1007_vm0, %v1006_v0 }
 0x2a5   : > { %951 = vmatmul.mubr.msk.f32.vlgmr.msra.gmra.mrb[6].mxu1 %vm144_vm1, %v643_v23 }
 0x36c   : > { %v1096_v24 = vpop.f32.mrb[0].mxu1 }
 0x36d   : > { %v927_v25 = vpop.f32.mrb[1].mxu1 }
 0x370   : > { %v382_v26 = vpop.f32.mrb[2].mxu1 }
 0x371   : > { %v386_v27 = vmul.f32 0.35355338, %v382_v26  ;;  %v932_v28 = vpop.f32.mrb[3].mxu1 }
 0x373   : > { %v387_v29 = vadd.f32 %v386_v27, %v139_v4 }
 0x374   : > { %v549_v30 = vpop.f32.mrb[4].mxu1 }
 0x375   : > { %v553_v31 = vmul.f32 0.35355338, %v549_v30  ;;  %v942_v32 = vpop.f32.mrb[5].mxu1  ;;  %v388_v33 = vsel %vm144_vm1, %v387_v29, -inf }
 0x376   : > { %389 = vmax.xlane.f32.xlu1 %v388_v33 }
 0x377   : > { %v554_v34 = vadd.f32 %v553_v31, %v139_v4 }
 0x378   : > { %v716_v35 = vpop.f32.mrb[6].mxu1 }
 0x379   : > { %v720_v36 = vmul.f32 0.35355338, %v716_v35  ;;  %v952_v37 = vpop.f32.mrb[7].mxu1  ;;  %v555_v38 = vsel %vm144_vm1, %v554_v34, -inf }
 0x37a   : > { %556 = vmax.xlane.f32.xlu0 %v555_v38 }
 0x37b   : > { %v721_v39 = vadd.f32 %v720_v36, %v139_v4 }
 0x37d   : > { %v722_v40 = vsel %vm144_vm1, %v721_v39, -inf }
 0x37e   : > { %723 = vmax.xlane.f32.xlu1 %v722_v40 }
 0x38f   : > { %399 = vrot.lane.b32.xlu1 %v1059_v1, %s1016_s25 }
 0x403   : > { %v390_v41 = vpop.xlane.xlu1 %389 }
 0x404   : > { %v391_v42 = vsub.f32 %v387_v29, %v390_v41 }
 0x406   : > { %v392_v43 = vmul.f32 1.442695, %v391_v42 }
 0x407   : > { %v557_v44 = vpop.xlane.xlu0 %556 }
 0x408   : > { %986 = vpow2.f32 %v392_v43  ;;  %v558_v45 = vsub.f32 %v554_v34, %v557_v44 }
 0x40a   : > { %v559_v46 = vmul.f32 1.442695, %v558_v45 }
 0x40b   : > { %v724_v47 = vpop.xlane.xlu1 %723 }
 0x40c   : > { %988 = vpow2.f32 %v559_v46  ;;  %v725_v48 = vsub.f32 %v721_v39, %v724_v47 }
 0x40e   : > { %v726_v49 = vmul.f32 1.442695, %v725_v48 }
 0x40f   : > { %v400_v50 = vpop.permute.xlu1 %399 }
 0x410   : > { %990 = vpow2.f32 %v726_v49  ;;  %934 = vmatpush3.msra.mxu0 %v400_v50 }
 0x411   : > { %943 = vmatprep.subr.mxu0 %v1006_v0 }
 0x412   : > { %v987_v51 = vpop.eup %986 }
 0x413   : > { %v394_v52 = vsel %vm144_vm1, %v987_v51, 0.0 }
 0x414   : > { %395 = vadd.xlane.f32.xlu1 %v394_v52 }
 0x416   : > { %v989_v53 = vpop.eup %988 }
 0x417   : > { %v561_v54 = vsel %vm144_vm1, %v989_v53, 0.0 }
 0x418   : > { %562 = vadd.xlane.f32.xlu1 %v561_v54 }
 0x41a   : > { %v991_v55 = vpop.eup %990 }
 0x41b   : > { %v728_v56 = vsel %vm144_vm1, %v991_v55, 0.0 }
 0x41c   : > { %729 = vadd.xlane.f32.xlu0 %v728_v56 }
 0x429   : > { %733 = vrot.lane.b32.xlu1 %v1059_v1, %s1017_s26 }
 0x432   : > { %566 = vrot.lane.b32.xlu0 %v1059_v1, %s1018_s27 }
 0x4a1   : > { %v396_v57 = vpop.xlane.xlu1 %395 }
 0x4a2   : > { %992 = vrcp.f32 %v396_v57 }
 0x4a5   : > { %v563_v58 = vpop.xlane.xlu1 %562 }
 0x4a6   : > { %994 = vrcp.f32 %v563_v58 }
 0x4a9   : > { %v730_v59 = vpop.xlane.xlu0 %729  ;;  %v734_v3 = vpop.permute.xlu1 %733 }
 0x4aa   : > { %996 = vrcp.f32 %v730_v59 }
 0x4ac   : > { %v993_v60 = vpop.eup %992 }
 0x4ad   : > { %v398_v61 = vmul.f32 %v993_v60, %v987_v51  ;;  %v567_v62 = vpop.permute.xlu0 %566 }
 0x4af   : > { %936 = vmatmul.mubr.msk.f32.vlgmr.msra.gmra.mrb[2].mxu0 %vm144_vm1, %v398_v61 }
 0x4b0   : > { %v995_v63 = vpop.eup %994  ;;  %944 = vmatpush3.msra.mxu0 %v567_v62  ;;  %945 = vmatprep.mubr.msk.f32.mxu0 %vm1007_vm0, %v1006_v0 }
 0x4b1   : > { %v565_v2 = vmul.f32 %v995_v63, %v989_v53  ;;  %953 = vmatprep.subr.mxu0 %v1006_v0 }
 0x4b3   : > { %946 = vmatmul.mubr.msk.f32.vlgmr.msra.gmra.mrb[4].mxu0 %vm144_vm1, %v565_v2 }
 0x4b4   : > { %v997_v1 = vpop.eup %996  ;;  %954 = vmatpush3.msra.mxu0 %v734_v3  ;;  %955 = vmatprep.mubr.msk.f32.mxu0 %vm1007_vm0, %v1006_v0 }
 0x4b5   : > { %v732_v4 = vmul.f32 %v997_v1, %v991_v55 }
 0x4b7   : > { %956 = vmatmul.mubr.msk.f32.vlgmr.msra.gmra.mrb[6].mxu0 %vm144_vm1, %v732_v4 }
 0x582   : > { %v471_v5 = vpop.f32.mrb[2].mxu0 }
 0x583   : > { %810 = vrot.lane.b32.xlu1 %v471_v5, %s1019_s28  ;;  %v937_v6 = vpop.f32.mrb[3].mxu0 }
 0x586   : > { %v638_v7 = vpop.f32.mrb[4].mxu0 }
 0x587   : > { %814 = vrot.lane.b32.xlu0 %v638_v7, %s1020_s29  ;;  %v947_v8 = vpop.f32.mrb[5].mxu0 }
 0x58a   : > { %v805_v9 = vpop.f32.mrb[6].mxu0 }
 0x58b   : > { %818 = vrot.lane.b32.xlu1 %v805_v9, %s1021_s30  ;;  %v957_v10 = vpop.f32.mrb[7].mxu0 }
 0x5f5   : > { %v811_v11 = vpop.permute.xlu1 %810 }
 0x5f6   : > { %v821_v0 = vsel %vm144_vm1, %v1096_v24, %v811_v11 }
 0x5f9   : > { %v815_v12 = vpop.permute.xlu0 %814 }
 0x5fa   : > { %v823_v13 = vsel %vm822_vm2, %v821_v0, %v815_v12 }
 0x5fd   : > { %v819_v14 = vpop.permute.xlu1 %818 }
 0x5fe   : > { %v825_v15 = vsel %vm824_vm3, %v823_v13, %v819_v14 }
 0x5ff   : > { %827 = vst.msk [vmem:[%s138_s5] sm:$0xff] %vm826_vm4, %v825_v15 }
 0x600 PF: > { %s12_s9 = sadd.s32 1, %s1004_s9  }
 0x601   : > { %p9_p4 = scmp.ge.s32.totalorder %s12_s9, 4  }
 0x603   :  { %11 = sbr.rel (!%p9_p4) target bundleno = 1 (0x1), region = 58 }

// kernel: _lambda_.21
= control target key start
LH: loop header
LB: loop body
LE: loop exit
PB: predicated region body
PF: predicated region fallthrough
CT: control target
= control target key end

     0   :  { %vm29_vm0 = vcmask 261120   ;;  %vm127_vm1 = vcmask 523264   ;;  %s238_s1 = inlined_call_operand.vmem [shape: f32[32,64], index: 1, kind: input, shape index: {}]   ;;  %s239_s0 = inlined_call_operand.vmem [shape: f32[32,32], index: 0, kind: input, shape index: {}]   ;;  %s240_s2 = inlined_call_operand.vmem [shape: f32[1,64], index: 2, kind: input, shape index: {}]   ;;  %s241_s3 = inlined_call_operand.vmem [shape: f32[32,64], index: 3, kind: output, shape index: {}]  }
   0x1   :  { %v18_v0 = vld [vmem:[%s238_s1] sm:$0xff]  ;;  %v19_v1 = vld [vmem:[%s238_s1 + $0x8] sm:$0xff]  ;;  %v20_v2 = vld [vmem:[%s238_s1 + $0x10] sm:$0xff] }
   0x2   :  { %v163_v3 = vpack.c.bf16 %v19_v1, %v18_v0  ;;  %v21_v4 = vld [vmem:[%s238_s1 + $0x18] sm:$0xff]  ;;  %v14_v5 = vld [vmem:[%s239_s0] sm:$0xff]  ;;  %v16_v6 = vld [vmem:[%s239_s0 + $0x10] sm:$0xff] }
   0x3   :  { %v167_v7 = vpack.c.bf16 %v21_v4, %v20_v2  ;;  %157 = vmatprep.mubr.msk.f32.mxu0 %vm29_vm0, %v14_v5  ;;  %160 = vmatprep.mubr.msk.f32.mxu1 %vm29_vm0, %v16_v6  ;;  %v15_v8 = vld [vmem:[%s239_s0 + $0x8] sm:$0xff]  ;;  %v17_v9 = vld [vmem:[%s239_s0 + $0x18] sm:$0xff]  ;;  %v136_v10 = vld [vmem:[%s240_s2] ss:$0 sm:$0xff] }
   0x4   :  { %164 = vmatprep.subr.bf16.mxu0 %v163_v3  ;;  %171 = vmatprep.subr.bf16.mxu1 %v163_v3 }
   0x5   :  { %166 = vmatpush3.bf16.msra.mxu0 %v163_v3  ;;  %173 = vmatpush3.bf16.msra.mxu1 %v163_v3 }
   0x6   :  { %168 = vmatprep.subr.bf16.mxu0 %v167_v7  ;;  %172 = vmatprep.subr.bf16.mxu1 %v167_v7 }
   0x9   :  { %170 = vmatpush3.bf16.msra.mxu0 %v167_v7  ;;  %174 = vmatpush3.bf16.msra.mxu1 %v167_v7 }
   0xc   :  { %158 = vmatmul.mubr.msk.f32.vlgmr.msra.gmra.mrb[0].mxu0 %vm29_vm0, %v15_v8  ;;  %161 = vmatmul.mubr.msk.f32.vlgmr.msra.gmra.mrb[0].mxu1 %vm29_vm0, %v17_v9 }
  0xdf   :  { %v159_v11 = vpop.f32.mrb[0].mxu0  ;;  %v162_v12 = vpop.f32.mrb[0].mxu1 }
  0xe0   :  { %v114_v13 = vadd.f32 %v159_v11, %v136_v10  ;;  %v124_v14 = vadd.f32 %v162_v12, %v136_v10  ;;  %v108_v15 = vpop.f32.mrb[1].mxu0  ;;  %v118_v16 = vpop.f32.mrb[1].mxu1 }
  0xe1   :  { %v109_v17 = vadd.f32 %v136_v10, %v108_v15  ;;  %v119_v18 = vadd.f32 %v136_v10, %v118_v16 }
  0xe2   :  { %129 = vst.msk [vmem:[%s241_s3 + $0x8] sm:$0xff] %vm127_vm1, %v114_v13  ;;  %131 = vst.msk [vmem:[%s241_s3 + $0x18] sm:$0xff] %vm127_vm1, %v124_v14 }
  0xe3   :  { %128 = vst.msk [vmem:[%s241_s3] sm:$0xff] %vm127_vm1, %v109_v17  ;;  %130 = vst.msk [vmem:[%s241_s3 + $0x10] sm:$0xff] %vm127_vm1, %v119_v18 }

// kernel: _lambda_.24
= control target key start
LH: loop header
LB: loop body
LE: loop exit
PB: predicated region body
PF: predicated region fallthrough
CT: control target
= control target key end

     0   :  { %vm39_vm0 = vcmask 261120   ;;  %vm138_vm1 = vcmask 523264   ;;  %s463_s1 = inlined_call_operand.vmem [shape: f32[32,64], index: 1, kind: input, shape index: {}]   ;;  %s464_s0 = inlined_call_operand.vmem [shape: f32[16,32], index: 0, kind: input, shape index: {}]   ;;  %s465_s3 = inlined_call_operand.vmem [shape: f32[64,32], index: 3, kind: input, shape index: {}]   ;;  %s466_s2 = inlined_call_operand.vmem [shape: f32[1,64], index: 2, kind: input, shape index: {}]   ;;  %s467_s4 = inlined_call_operand.vmem [shape: f32[1,32], index: 4, kind: input, shape index: {}]   ;;  %s468_s5 = inlined_call_operand.vmem [shape: f32[1,32], index: 5, kind: input, shape index: {}]   ;;  %s469_s6 = inlined_call_operand.vmem [shape: f32[1,32], index: 6, kind: input, shape index: {}]   ;;  %s470_s7 = inlined_call_operand.vmem [shape: f32[16,32], index: 7, kind: output, shape index: {}]  }
   0x1   :  { %v28_v0 = vld [vmem:[%s463_s1] sm:$0xff]  ;;  %v29_v1 = vld [vmem:[%s463_s1 + $0x8] sm:$0xff]  ;;  %v30_v2 = vld [vmem:[%s463_s1 + $0x10] sm:$0xff] }
   0x2   :  { %v327_v3 = vpack.c.bf16 %v29_v1, %v28_v0  ;;  %v31_v4 = vld [vmem:[%s463_s1 + $0x18] sm:$0xff]  ;;  %v26_v5 = vld [vmem:[%s464_s0] sm:$0xff]  ;;  %v124_v8 = vld [vmem:[%s465_s3 + $0x8] sm:$0xff] }
   0x3   :  { %v331_v6 = vpack.c.bf16 %v31_v4, %v30_v2  ;;  %305 = vmatprep.mubr.msk.f32.mxu0 %vm39_vm0, %v26_v5  ;;  %v123_v7 = vld [vmem:[%s465_s3] sm:$0xff]  ;;  %v125_v9 = vld [vmem:[%s465_s3 + $0x10] sm:$0xff]  ;;  %v126_v11 = vld [vmem:[%s465_s3 + $0x18] sm:$0xff] }
   0x4   :  { %328 = vmatprep.subr.bf16.mxu0 %v327_v3  ;;  %v335_v10 = vpack.c.bf16 %v124_v8, %v123_v7  ;;  %v339_v12 = vpack.c.bf16 %v126_v11, %v125_v9  ;;  %v127_v13 = vld [vmem:[%s465_s3 + $0x20] sm:$0xff]  ;;  %v128_v14 = vld [vmem:[%s465_s3 + $0x28] sm:$0xff]  ;;  %v129_v17 = vld [vmem:[%s465_s3 + $0x30] sm:$0xff] }
   0x5   :  { %330 = vmatpush3.bf16.msra.mxu0 %v327_v3  ;;  %v343_v15 = vpack.c.bf16 %v128_v14, %v127_v13  ;;  %v27_v16 = vld [vmem:[%s464_s0 + $0x8] sm:$0xff]  ;;  %v130_v18 = vld [vmem:[%s465_s3 + $0x38] sm:$0xff]  ;;  %v273_v20 = vld [vmem:[%s466_s2] ss:$0 sm:$0xff] }
   0x6   :  { %332 = vmatprep.subr.bf16.mxu0 %v331_v6  ;;  %336 = vmatprep.subr.bf16.mxu1 %v335_v10  ;;  %v347_v19 = vpack.c.bf16 %v130_v18, %v129_v17  ;;  %v276_v27 = vld [vmem:[%s467_s4] ss:$0 sm:$0xff] }
   0x7   :  { %338 = vmatpush3.bf16.msra.mxu1 %v335_v10  ;;  %v279_v53 = vld [vmem:[%s468_s5] ss:$0 sm:$0xff] }
   0x8   :  { %340 = vmatprep.subr.bf16.mxu1 %v339_v12  ;;  %v280_v55 = vld [vmem:[%s469_s6] ss:$0 sm:$0xff] }
   0x9   :  { %334 = vmatpush3.bf16.msra.mxu0 %v331_v6 }
   0xb   :  { %342 = vmatpush3.bf16.msra.mxu1 %v339_v12 }
   0xc   :  { %306 = vmatmul.mubr.msk.f32.vlgmr.msra.gmra.mrb[0].mxu0 %vm39_vm0, %v27_v16  ;;  %344 = vmatprep.subr.bf16.mxu1 %v343_v15 }
   0xf   :  { %346 = vmatpush3.bf16.msra.mxu1 %v343_v15 }
  0x10   :  { %348 = vmatprep.subr.bf16.mxu1 %v347_v19 }
  0x13   :  { %350 = vmatpush3.bf16.msra.mxu1 %v347_v19 }
  0xdf   :  { %v307_v21 = vpop.f32.mrb[0].mxu0 }
  0xe0   :  { %v118_v22 = vadd.f32 %v307_v21, %v273_v20  ;;  %v112_v23 = vpop.f32.mrb[1].mxu0 }
  0xe1   :  { %v113_v24 = vadd.f32 %v273_v20, %v112_v23 }
  0xe2   :  { %v122_v26 = vmax.f32 %v118_v22, 0.0 }
  0xe3   :  { %v121_v25 = vmax.f32 %v113_v24, 0.0 }
  0xe5   :  { %324 = vmatprep.mubr.msk.f32.mxu1 %vm138_vm1, %v121_v25 }
  0xe6   :  { %325 = vmatmul.mubr.msk.f32.vlgmr.msra.gmra.mrb[0].mxu1 %vm138_vm1, %v122_v26 }
 0x1b9   :  { %v326_v28 = vpop.f32.mrb[0].mxu1 }
 0x1ba   :  { %v211_v29 = vpop.f32.mrb[1].mxu1  ;;  %v217_v30 = vadd.f32 %v326_v28, %v276_v27 }
 0x1bb   :  { %v212_v31 = vadd.f32 %v276_v27, %v211_v29 }
 0x1bc   :  { %v221_v34 = vadd.f32 %v217_v30, %v27_v16 }
 0x1bd   :  { %v220_v32 = vadd.f32 %v212_v31, %v26_v5 }
 0x1be   :  { %v225_v35 = vsel %vm39_vm0, %v221_v34, 0.0 }
 0x1bf   :  { %v222_v33 = vsel %vm39_vm0, %v220_v32, 0.0 }
 0x1c0   :  { %223 = vadd.xlane.f32.xlu0 %v222_v33 }
 0x1c4   :  { %226 = vadd.xlane.f32.xlu0 %v225_v35 }
 0x24d   :  { %v224_v36 = vpop.xlane.xlu0 %223 }
 0x24e   :  { %v229_v37 = vmul.f32 0.03125, %v224_v36 }
 0x250   :  { %v231_v38 = vsub.f32 %v220_v32, %v229_v37 }
 0x251   :  { %v227_v39 = vpop.xlane.xlu0 %226 }
 0x252   :  { %v230_v40 = vmul.f32 0.03125, %v227_v39  ;;  %v233_v41 = vmul.f32 %v231_v38, %v231_v38 }
 0x254   :  { %v232_v42 = vsub.f32 %v221_v34, %v230_v40  ;;  %v235_v43 = vsel %vm39_vm0, %v233_v41, 0.0 }
 0x255   :  { %236 = vadd.xlane.f32.xlu1 %v235_v43 }
 0x256   :  { %v234_v44 = vmul.f32 %v232_v42, %v232_v42 }
 0x258   :  { %v238_v45 = vsel %vm39_vm0, %v234_v44, 0.0 }
 0x259   :  { %239 = vadd.xlane.f32.xlu1 %v238_v45 }
 0x2e2   :  { %v237_v46 = vpop.xlane.xlu1 %236 }
 0x2e3   :  { %v241_v47 = vmul.f32 0.03125, %v237_v46 }
 0x2e5   :  { %v243_v48 = vadd.f32 1e-05, %v241_v47 }
 0x2e6   :  { %v240_v49 = vpop.xlane.xlu1 %239 }
 0x2e7   :  { %351 = vrsqrt.f32 %v243_v48  ;;  %v242_v50 = vmul.f32 0.03125, %v240_v49 }
 0x2e9   :  { %v244_v51 = vadd.f32 1e-05, %v242_v50 }
 0x2eb   :  { %353 = vrsqrt.f32 %v244_v51 }
 0x2f1   :  { %v352_v52 = vpop.eup %351 }
 0x2f2   :  { %v247_v54 = vmul.f32 %v352_v52, %v231_v38 }
 0x2f4   :  { %v256_v56 = vmul.f32 %v279_v53, %v247_v54 }
 0x2f5   :  { %v354_v57 = vpop.eup %353 }
 0x2f6   :  { %v265_v58 = vadd.f32 %v280_v55, %v256_v56  ;;  %v248_v59 = vmul.f32 %v354_v57, %v232_v42 }
 0x2f8   :  { %267 = vst.msk [vmem:[%s470_s7] sm:$0xff] %vm39_vm0, %v265_v58  ;;  %v257_v60 = vmul.f32 %v279_v53, %v248_v59 }
 0x2fa   :  { %v266_v61 = vadd.f32 %v280_v55, %v257_v60 }
 0x2fc   :  { %268 = vst.msk [vmem:[%s470_s7 + $0x8] sm:$0xff] %vm39_vm0, %v266_v61 }

// kernel: _lambda_.22
= control target key start
LH: loop header
LB: loop body
LE: loop exit
PB: predicated region body
PF: predicated region fallthrough
CT: control target
= control target key end

     0   :  { %s1180_s9 = smov 0   ;;  %s1282_s0 = inlined_call_operand.vmem [shape: f32[2,8,32], index: 0, kind: input, shape index: {}]   ;;  %s1283_s1 = inlined_call_operand.vmem [shape: f32[2,16,64], index: 1, kind: input, shape index: {}]   ;;  %s1284_s2 = inlined_call_operand.vmem [shape: f32[2,8,32], index: 2, kind: output, shape index: {}]  }
   0x1 LB: > { %s936_s10 = sadd.s32 4294967295, %s1150_s9   ;;  %p940_p0 = scmp.ge.s32.totalorder %s1150_s9, 1  ;;  %s1150_s9 = sphi %s1180_s9, %s12_s9  }
   0x2   : > { %p121_p1 = scmp.lt.s32.totalorder %s1150_s9, 3 }
   0x4   : > { %p122_p2 = pnand %p940_p0, %p121_p1 }
   0x5   : > { %p146_p3 = scmp.lt.s32.totalorder (!%p122_p2), %s936_s10, 1  ;;  %v1152_v0 = vmov (!%p122_p2), 0.0|0.0   ;;  %vm1153_vm0 = vmmov (!%p122_p2), 0   ;;  %v1154_v1 = vmov (!%p122_p2), 0.0   ;;  %vm162_vm1 = vcmask (!%p122_p2), 64512   ;;  %s1155_s19 = smov (!%p122_p2), 96  }
   0x6   : > { %125 = sbr.rel (%p122_p2) target bundleno = 2491 (0x9bb), region = 28  ;;  %1044 = vmatprep.subr.bf16.mxu0 (!%p122_p2), %v1152_v0  ;;  %992 = vmatprep.mubr.msk.f32.mxu0 (!%p122_p2), %vm1153_vm0, %v1154_v1  ;;  %vm1202_vm2 = vmpackc.low (!%p122_p2), %vm162_vm1, %vm162_vm1  ;;  %vm243_vm3 = vcmask (!%p122_p2), 130048   ;;  %s1156_s20 = smov (!%p122_p2), 120   ;;  %vm867_vm4 = vcmask (!%p122_p2), 195584   ;;  %vm869_vm5 = vcmask (!%p122_p2), 261120  }
   0x7   : > { %1048 = vmatprep.subr.bf16.mxu1 (!%p122_p2), %v1152_v0  ;;  %999 = vmatprep.mubr.msk.f32.mxu1 (!%p122_p2), %vm1153_vm0, %v1154_v1  ;;  %s1157_s21 = smov (!%p122_p2), 88   ;;  %s1158_s22 = smov (!%p122_p2), 112  }
   0x8   : > { %s1159_s23 = smov (!%p122_p2), 80   ;;  %s1160_s24 = smov (!%p122_p2), 104  }
   0x9   : > { %s1161_s25 = smov (!%p122_p2), 72   ;;  %s1162_s26 = smov (!%p122_p2), 16  }
   0xa   : > { %s1163_s27 = smov (!%p122_p2), 8   ;;  %s1164_s28 = smov (!%p122_p2), 24  }
   0xd   : > { %s1288_s10 = smov (!%p146_p3, %s936_s10), 1 }
   0xe   : > { %s963_s11 = sshll.u32 %s1288_s10, 4  ;;  %s941_s15 = sshll.u32 %s1288_s10, 3 }
   0xf   : > { %s154_s14 = scalar_lea.vmem %s1283_s1, %s963_s11  ;;  %s149_s18 = scalar_lea.vmem %s1282_s0, %s941_s15 }
  0x10   : > { %v160_v2 = vld [vmem:[%s154_s14] sm:$0xff]  ;;  %v161_v3 = vld [vmem:[%s154_s14 + $0x8] sm:$0xff]  ;;  %s158_s3 = scalar_lea.vmem %s1284_s2, %s941_s15 }
  0x11   : > { %v1045_v5 = vpack.c.bf16 %v161_v3, %v160_v2  ;;  %v1215_v6 = vld [vmem:[%s149_s18] sm:$0xff]  ;;  %v1222_v11 = vpack.i.bf16 %v161_v3, %v160_v2 }
  0x13   : > { %1047 = vmatpush3.bf16.xpose.msk.msra.mxu0 %vm1202_vm2, %v1045_v5  ;;  %1094 = vrot.lane.b32.xlu1 %v1222_v11, %s1155_s19 }
  0x14   : > { %1055 = vmatprep.subr.bf16.mxu0 %v1152_v0 }
  0x17   : > { %1099 = vrot.lane.b32.xlu1 %v1222_v11, %s1156_s20 }
  0x1a   : > { %993 = vmatmul.mubr.msk.f32.vlgmr.msra.gmra.mrb[0].mxu0 %vm162_vm1, %v1215_v6 }
  0x1b   : > { %1013 = vmatprep.mubr.msk.f32.mxu0 %vm1153_vm0, %v1154_v1 }
  0x85   : > { %v1095_v17 = vpop.permute.xlu1 %1094 }
  0x86   : > { %v1097_v18 = vunpack.i.h.bf16 %v1095_v17  ;;  %v1096_v19 = vunpack.i.l.bf16 %v1095_v17 }
  0x88   : > { %v1049_v20 = vpack.c.bf16 %v1097_v18, %v1096_v19 }
  0x89   : > { %v1100_v22 = vpop.permute.xlu1 %1099 }
  0x8a   : > { %1050 = vmatpush3.bf16.msra.mxu1 %v1049_v20  ;;  %v1102_v23 = vunpack.i.h.bf16 %v1100_v22  ;;  %v1101_v24 = vunpack.i.l.bf16 %v1100_v22 }
  0x8b   : > { %1051 = vmatprep.subr.bf16.mxu1 %v1152_v0 }
  0x8c   : > { %v1052_v26 = vpack.c.bf16 %v1102_v23, %v1101_v24 }
  0xed   : > { %v238_v7 = vpop.f32.mrb[0].mxu0 }
  0xee   : > { %v242_v8 = vmul.f32 0.35355338, %v238_v7  ;;  %v994_v9 = vpop.f32.mrb[1].mxu0 }
  0xf0   : > { %v244_v10 = vsel %vm243_vm3, %v242_v8, -inf }
  0xf1   : > { %245 = vmax.xlane.f32.xlu0 %v244_v10 }
 0x17e   : > { %v246_v12 = vpop.xlane.xlu0 %245 }
 0x17f   : > { %v247_v13 = vsub.f32 %v242_v8, %v246_v12 }
 0x181   : > { %v248_v14 = vmul.f32 1.442695, %v247_v13 }
 0x183   : > { %1128 = vpow2.f32 %v248_v14 }
 0x18d   : > { %v1129_v15 = vpop.eup %1128 }
 0x18e   : > { %v250_v16 = vsel %vm243_vm3, %v1129_v15, 0.0 }
 0x18f   : > { %251 = vadd.xlane.f32.xlu0 %v250_v16 }
 0x1a5   : > { %334 = vrot.lane.b32.xlu0 %v1215_v6, %s1156_s20 }
 0x21c   : > { %v252_v21 = vpop.xlane.xlu0 %251 }
 0x21d   : > { %1130 = vrcp.f32 %v252_v21 }
 0x220   : > { %v335_v28 = vpop.permute.xlu0 %334 }
 0x227   : > { %v1131_v25 = vpop.eup %1130 }
 0x228   : > { %v254_v27 = vmul.f32 %v1131_v25, %v1129_v15 }
 0x22a   : > { %1000 = vmatmul.mubr.msk.f32.vlgmr.msra.gmra.mrb[0].mxu1 %vm243_vm3, %v254_v27 }
 0x22b   : > { %1054 = vmatpush3.bf16.xpose.msk.msra.mxu1 %vm1202_vm2, %v1052_v26  ;;  %1006 = vmatprep.mubr.msk.f32.mxu1 %vm1153_vm0, %v1154_v1 }
 0x22c   : > { %1062 = vmatprep.subr.bf16.mxu1 %v1152_v0 }
 0x232   : > { %1007 = vmatmul.mubr.msk.f32.vlgmr.msra.gmra.mrb[2].mxu1 %vm162_vm1, %v335_v28 }
 0x233   : > { %1027 = vmatprep.mubr.msk.f32.mxu1 %vm1153_vm0, %v1154_v1 }
 0x2fd   : > { %v1238_v29 = vpop.f32.mrb[0].mxu1 }
 0x2fe   : > { %v1001_v30 = vpop.f32.mrb[1].mxu1 }
 0x305   : > { %v412_v31 = vpop.f32.mrb[2].mxu1 }
 0x306   : > { %v416_v32 = vmul.f32 0.35355338, %v412_v31  ;;  %v1008_v33 = vpop.f32.mrb[3].mxu1 }
 0x308   : > { %v417_v34 = vsel %vm243_vm3, %v416_v32, -inf }
 0x309   : > { %418 = vmax.xlane.f32.xlu1 %v417_v34 }
 0x31a   : > { %1104 = vrot.lane.b32.xlu1 %v1222_v11, %s1157_s21 }
 0x31e   : > { %507 = vrot.lane.b32.xlu1 %v1215_v6, %s1158_s22 }
 0x396   : > { %v419_v35 = vpop.xlane.xlu1 %418 }
 0x397   : > { %v420_v36 = vsub.f32 %v416_v32, %v419_v35 }
 0x399   : > { %v421_v37 = vmul.f32 1.442695, %v420_v36 }
 0x39a   : > { %v1105_v40 = vpop.permute.xlu1 %1104 }
 0x39b   : > { %1132 = vpow2.f32 %v421_v37  ;;  %v1107_v41 = vunpack.i.h.bf16 %v1105_v40  ;;  %v1106_v42 = vunpack.i.l.bf16 %v1105_v40 }
 0x39d   : > { %v1056_v43 = vpack.c.bf16 %v1107_v41, %v1106_v42 }
 0x39e   : > { %v508_v51 = vpop.permute.xlu1 %507 }
 0x39f   : > { %1057 = vmatpush3.bf16.msra.mxu0 %v1056_v43 }
 0x3a0   : > { %1058 = vmatprep.subr.bf16.mxu0 %v1152_v0 }
 0x3a5   : > { %v1133_v38 = vpop.eup %1132 }
 0x3a6   : > { %v423_v39 = vsel %vm243_vm3, %v1133_v38, 0.0 }
 0x3a7   : > { %424 = vadd.xlane.f32.xlu0 %v423_v39 }
 0x3bd   : > { %1109 = vrot.lane.b32.xlu0 %v1222_v11, %s1158_s22 }
 0x434   : > { %v425_v44 = vpop.xlane.xlu0 %424 }
 0x435   : > { %1134 = vrcp.f32 %v425_v44 }
 0x438   : > { %v1110_v45 = vpop.permute.xlu0 %1109 }
 0x439   : > { %v1112_v46 = vunpack.i.h.bf16 %v1110_v45  ;;  %v1111_v47 = vunpack.i.l.bf16 %v1110_v45 }
 0x43b   : > { %v1059_v49 = vpack.c.bf16 %v1112_v46, %v1111_v47 }
 0x43f   : > { %v1135_v48 = vpop.eup %1134 }
 0x440   : > { %v427_v50 = vmul.f32 %v1135_v48, %v1133_v38 }
 0x442   : > { %1014 = vmatmul.mubr.msk.f32.vlgmr.msra.gmra.mrb[2].mxu0 %vm243_vm3, %v427_v50 }
 0x443   : > { %1061 = vmatpush3.bf16.xpose.msk.msra.mxu0 %vm1202_vm2, %v1059_v49  ;;  %1020 = vmatprep.mubr.msk.f32.mxu0 %vm1153_vm0, %v1154_v1 }
 0x444   : > { %1069 = vmatprep.subr.bf16.mxu0 %v1152_v0 }
 0x44a   : > { %1021 = vmatmul.mubr.msk.f32.vlgmr.msra.gmra.mrb[4].mxu0 %vm162_vm1, %v508_v51 }
 0x44b   : > { %1041 = vmatprep.mubr.msk.f32.mxu0 %vm1153_vm0, %v1154_v1 }
 0x515   : > { %v503_v52 = vpop.f32.mrb[2].mxu0 }
 0x516   : > { %v1015_v53 = vpop.f32.mrb[3].mxu0 }
 0x51d   : > { %v585_v54 = vpop.f32.mrb[4].mxu0 }
 0x51e   : > { %v589_v55 = vmul.f32 0.35355338, %v585_v54  ;;  %v1022_v56 = vpop.f32.mrb[5].mxu0 }
 0x520   : > { %v590_v57 = vsel %vm243_vm3, %v589_v55, -inf }
 0x521   : > { %591 = vmax.xlane.f32.xlu1 %v590_v57 }
 0x532   : > { %1114 = vrot.lane.b32.xlu1 %v1222_v11, %s1159_s23 }
 0x536   : > { %680 = vrot.lane.b32.xlu1 %v1215_v6, %s1160_s24 }
 0x5ae   : > { %v592_v58 = vpop.xlane.xlu1 %591 }
 0x5af   : > { %v593_v59 = vsub.f32 %v589_v55, %v592_v58 }
 0x5b1   : > { %v594_v60 = vmul.f32 1.442695, %v593_v59 }
 0x5b2   : > { %v1115_v63 = vpop.permute.xlu1 %1114 }
 0x5b3   : > { %1136 = vpow2.f32 %v594_v60  ;;  %v1117_v2 = vunpack.i.h.bf16 %v1115_v63  ;;  %v1116_v3 = vunpack.i.l.bf16 %v1115_v63 }
 0x5b5   : > { %v1063_v5 = vpack.c.bf16 %v1117_v2, %v1116_v3 }
 0x5b6   : > { %v681_v14 = vpop.permute.xlu1 %680 }
 0x5b7   : > { %1064 = vmatpush3.bf16.msra.mxu1 %v1063_v5 }
 0x5b8   : > { %1065 = vmatprep.subr.bf16.mxu1 %v1152_v0 }
 0x5bd   : > { %v1137_v61 = vpop.eup %1136 }
 0x5be   : > { %v596_v62 = vsel %vm243_vm3, %v1137_v61, 0.0 }
 0x5bf   : > { %597 = vadd.xlane.f32.xlu0 %v596_v62 }
 0x5d5   : > { %1119 = vrot.lane.b32.xlu0 %v1222_v11, %s1160_s24 }
 0x64c   : > { %v598_v7 = vpop.xlane.xlu0 %597 }
 0x64d   : > { %1138 = vrcp.f32 %v598_v7 }
 0x650   : > { %v1120_v6 = vpop.permute.xlu0 %1119 }
 0x651   : > { %v1122_v8 = vunpack.i.h.bf16 %v1120_v6  ;;  %v1121_v9 = vunpack.i.l.bf16 %v1120_v6 }
 0x653   : > { %v1066_v12 = vpack.c.bf16 %v1122_v8, %v1121_v9 }
 0x657   : > { %v1139_v10 = vpop.eup %1138 }
 0x658   : > { %v600_v13 = vmul.f32 %v1139_v10, %v1137_v61 }
 0x65a   : > { %1028 = vmatmul.mubr.msk.f32.vlgmr.msra.gmra.mrb[4].mxu1 %vm243_vm3, %v600_v13 }
 0x65b   : > { %1068 = vmatpush3.bf16.xpose.msk.msra.mxu1 %vm1202_vm2, %v1066_v12  ;;  %1034 = vmatprep.mubr.msk.f32.mxu1 %vm1153_vm0, %v1154_v1 }
 0x662   : > { %1035 = vmatmul.mubr.msk.f32.vlgmr.msra.gmra.mrb[6].mxu1 %vm162_vm1, %v681_v14 }
 0x72d   : > { %v676_v0 = vpop.f32.mrb[4].mxu1 }
 0x72e   : > { %v1029_v15 = vpop.f32.mrb[5].mxu1 }
 0x735   : > { %v758_v16 = vpop.f32.mrb[6].mxu1 }
 0x736   : > { %v762_v17 = vmul.f32 0.35355338, %v758_v16  ;;  %v1036_v18 = vpop.f32.mrb[7].mxu1 }
 0x738   : > { %v763_v19 = vsel %vm243_vm3, %v762_v17, -inf }
 0x739   : > { %764 = vmax.xlane.f32.xlu1 %v763_v19 }
 0x74a   : > { %1124 = vrot.lane.b32.xlu1 %v1222_v11, %s1161_s25 }
 0x74e   : > { %858 = vrot.lane.b32.xlu1 %v676_v0, %s1162_s26 }
 0x7c6   : > { %v765_v4 = vpop.xlane.xlu1 %764 }
 0x7c7   : > { %v766_v20 = vsub.f32 %v762_v17, %v765_v4 }
 0x7c9   : > { %v767_v21 = vmul.f32 1.442695, %v766_v20 }
 0x7ca   : > { %v1125_v1 = vpop.permute.xlu1 %1124 }
 0x7cb   : > { %1140 = vpow2.f32 %v767_v21  ;;  %v1127_v22 = vunpack.i.h.bf16 %v1125_v1  ;;  %v1126_v23 = vunpack.i.l.bf16 %v1125_v1 }
 0x7cd   : > { %v1070_v24 = vpack.c.bf16 %v1127_v22, %v1126_v23 }
 0x7ce   : > { %v859_v33 = vpop.permute.xlu1 %858 }
 0x7cf   : > { %1071 = vmatpush3.bf16.msra.mxu0 %v1070_v24 }
 0x7d5   : > { %v1141_v25 = vpop.eup %1140 }
 0x7d6   : > { %v769_v26 = vsel %vm243_vm3, %v1141_v25, 0.0 }
 0x7d7   : > { %770 = vadd.xlane.f32.xlu0 %v769_v26 }
 0x7ed   : > { %854 = vrot.lane.b32.xlu0 %v503_v52, %s1163_s27 }
 0x864   : > { %v771_v27 = vpop.xlane.xlu0 %770 }
 0x865   : > { %1142 = vrcp.f32 %v771_v27 }
 0x868   : > { %v855_v32 = vpop.permute.xlu0 %854 }
 0x869   : > { %v865_v34 = vsel %vm162_vm1, %v1238_v29, %v855_v32 }
 0x86a   : > { %v866_v35 = vsel %vm243_vm3, %v865_v34, %v859_v33 }
 0x86f   : > { %v1143_v11 = vpop.eup %1142 }
 0x870   : > { %v773_v28 = vmul.f32 %v1143_v11, %v1141_v25 }
 0x872   : > { %1042 = vmatmul.mubr.msk.f32.vlgmr.msra.gmra.mrb[6].mxu0 %vm243_vm3, %v773_v28 }
 0x945   : > { %v849_v30 = vpop.f32.mrb[6].mxu0 }
 0x946   : > { %862 = vrot.lane.b32.xlu1 %v849_v30, %s1164_s28  ;;  %v1043_v31 = vpop.f32.mrb[7].mxu0 }
 0x9b8   : > { %v863_v36 = vpop.permute.xlu1 %862 }
 0x9b9   : > { %v868_v37 = vsel %vm867_vm4, %v866_v35, %v863_v36 }
 0x9ba   : > { %870 = vst.msk [vmem:[%s158_s3] sm:$0xff] %vm869_vm5, %v868_v37 }
 0x9bb PF: > { %s12_s9 = sadd.s32 1, %s1150_s9  }
 0x9bc   : > { %p9_p4 = scmp.ge.s32.totalorder %s12_s9, 4  }
 0x9be   :  { %11 = sbr.rel (!%p9_p4) target bundleno = 1 (0x1), region = 61 }

// kernel: _lambda_.33
= control target key start
LH: loop header
LB: loop body
LE: loop exit
PB: predicated region body
PF: predicated region fallthrough
CT: control target
= control target key end

     0   :  { %vm23_vm0 = vcmask 261120   ;;  %s319_s0 = inlined_call_operand.vmem [shape: f32[16,32], index: 0, kind: input, shape index: {}]   ;;  %s320_s1 = inlined_call_operand.vmem [shape: f32[1,32], index: 1, kind: input, shape index: {}]   ;;  %s321_s2 = inlined_call_operand.vmem [shape: f32[1,32], index: 2, kind: input, shape index: {}]   ;;  %s322_s3 = inlined_call_operand.vmem [shape: f32[32,64], index: 3, kind: input, shape index: {}]   ;;  %s323_s4 = inlined_call_operand.vmem [shape: f32[1,64], index: 4, kind: input, shape index: {}]   ;;  %s324_s5 = inlined_call_operand.hbm [shape: f32[16,64], index: 5, kind: output, shape index: {}]  }
   0x1   :  { %v21_v0 = vld [vmem:[%s319_s0] sm:$0xff]  ;;  %v22_v1 = vld [vmem:[%s319_s0 + $0x8] sm:$0xff] }
   0x2   :  { %10 = vsyncpa [#allocation3], 0  ;;  %v24_v2 = vsel %vm23_vm0, %v21_v0, 0.0  ;;  %v27_v3 = vsel %vm23_vm0, %v22_v1, 0.0  ;;  %v69_v14 = vld [vmem:[%s322_s3] sm:$0xff]  ;;  %v70_v15 = vld [vmem:[%s322_s3 + $0x8] sm:$0xff] }
   0x3   :  { %25 = vadd.xlane.f32.xlu0 %v24_v2  ;;  %v71_v16 = vld [vmem:[%s322_s3 + $0x10] sm:$0xff]  ;;  %v202_v17 = vpack.c.bf16 %v70_v15, %v69_v14  ;;  %v72_v18 = vld [vmem:[%s322_s3 + $0x18] sm:$0xff]  ;;  %v180_v27 = vld [vmem:[%s320_s1] ss:$0 sm:$0xff]  ;;  %s241_s1 = smov [#allocation2]   ;;  %vm161_vm1 = vcmask 523264  }
   0x4   :  { %v206_v19 = vpack.c.bf16 %v72_v18, %v71_v16  ;;  %v181_v29 = vld [vmem:[%s321_s2] ss:$0 sm:$0xff]  ;;  %s169_s9 = sshll.u32 %s241_s1, 4  ;;  %s170_s9 = int_to_ptr.vmem [resolvable:$true] %s169_s9 }
   0x5   :  { %203 = vmatprep.subr.bf16.mxu0 %v202_v17  ;;  %v182_v36 = vld [vmem:[%s323_s4] ss:$0 sm:$0xff]  ;;  %s217_s2 = scalar_lea.vmem %s170_s9, 256  ;;  %p222_p1 = scmp.lt.s32.totalorder %s170_s9, %s170_s9 }
   0x6   :  { %205 = vmatpush3.bf16.msra.mxu0 %v202_v17  ;;  %p218_p0 = scmp.ne.s32.totalorder %s170_s9, %s217_s2  ;;  %p223_p2 = scmp.lt.s32.totalorder %s217_s2, %s217_s2 }
   0x7   :  { %28 = vadd.xlane.f32.xlu0 %v27_v3  ;;  %207 = vmatprep.subr.bf16.mxu0 %v206_v19 }
   0x8   :  { %p224_p3 = por %p223_p2, %p222_p1 }
   0xa   :  { %209 = vmatpush3.bf16.msra.mxu0 %v206_v19  ;;  %p225_p4 = pnand %p224_p3, %p218_p0 }
  0x90   :  { %v26_v4 = vpop.xlane.xlu0 %25 }
  0x91   :  { %v31_v5 = vmul.f32 0.03125, %v26_v4 }
  0x93   :  { %v33_v6 = vsub.f32 %v21_v0, %v31_v5 }
  0x94   :  { %v29_v7 = vpop.xlane.xlu0 %28 }
  0x95   :  { %v32_v8 = vmul.f32 0.03125, %v29_v7  ;;  %v35_v9 = vmul.f32 %v33_v6, %v33_v6 }
  0x97   :  { %v34_v10 = vsub.f32 %v22_v1, %v32_v8  ;;  %v37_v11 = vsel %vm23_vm0, %v35_v9, 0.0 }
  0x98   :  { %38 = vadd.xlane.f32.xlu1 %v37_v11 }
  0x99   :  { %v36_v12 = vmul.f32 %v34_v10, %v34_v10 }
  0x9b   :  { %v40_v13 = vsel %vm23_vm0, %v36_v12, 0.0 }
  0x9c   :  { %41 = vadd.xlane.f32.xlu1 %v40_v13 }
 0x125   :  { %v39_v20 = vpop.xlane.xlu1 %38 }
 0x126   :  { %v43_v21 = vmul.f32 0.03125, %v39_v20 }
 0x128   :  { %v45_v22 = vadd.f32 1e-05, %v43_v21 }
 0x129   :  { %v42_v23 = vpop.xlane.xlu1 %41 }
 0x12a   :  { %213 = vrsqrt.f32 %v45_v22  ;;  %v44_v24 = vmul.f32 0.03125, %v42_v23 }
 0x12c   :  { %v46_v25 = vadd.f32 1e-05, %v44_v24 }
 0x12e   :  { %215 = vrsqrt.f32 %v46_v25 }
 0x134   :  { %v214_v26 = vpop.eup %213 }
 0x135   :  { %v49_v28 = vmul.f32 %v214_v26, %v33_v6 }
 0x137   :  { %v58_v30 = vmul.f32 %v180_v27, %v49_v28 }
 0x138   :  { %v216_v31 = vpop.eup %215 }
 0x139   :  { %v50_v32 = vmul.f32 %v216_v31, %v34_v10  ;;  %v67_v33 = vadd.f32 %v181_v29, %v58_v30 }
 0x13b   :  { %v59_v34 = vmul.f32 %v180_v27, %v50_v32  ;;  %199 = vmatprep.mubr.msk.f32.mxu0 %vm23_vm0, %v67_v33 }
 0x13d   :  { %v68_v35 = vadd.f32 %v181_v29, %v59_v34 }
 0x13f   :  { %200 = vmatmul.mubr.msk.f32.vlgmr.msra.gmra.mrb[0].mxu0 %vm23_vm0, %v68_v35 }
 0x212   :  { %v201_v37 = vpop.f32.mrb[0].mxu0 }
 0x213   :  { %v158_v38 = vadd.f32 %v201_v37, %v182_v36  ;;  %v152_v39 = vpop.f32.mrb[1].mxu0 }
 0x214   :  { %v153_v40 = vadd.f32 %v182_v36, %v152_v39 }
 0x215   :  { %163 = vst.msk [vmem:[#allocation2 + $0x8] sm:$0xff] %vm161_vm1, %v158_v38 }
 0x216   :  { %162 = vst.msk [vmem:[#allocation2] sm:$0xff] %vm161_vm1, %v153_v40 }
 0x217   :  { %228 = shalt.err (!%p225_p4)
}
 0x218   :  { %s229_s4 = scalar_lea.hbm %s324_s5, 256 }
 0x219   :  { %p230_p5 = scmp.ne.s32.totalorder %s324_s5, %s229_s4  ;;  %p233_p6 = scmp.lt.u32.totalorder %s229_s4, %s324_s5 }
 0x21b   :  { %p235_p7 = pnand %p233_p6, %p230_p5 }
 0x21d   :  { %238 = shalt.err (!%p235_p7)
}
 0x21e   :  { %s242_s16 = smov 128   ;;  %s243_s17 = smov 8  }
 0x21f   :  { %175 = dma.vmem_to_hbm [thread:$0]  %s170_s9, 256, %s324_s5, [#allocation3], %s242_s16, %s242_s16, %s243_s17  }
 0x220   :  { %239 = dma.done.wait [#allocation3], 256  }
 0x221   :  { %240 = vsyncadd [#allocation3], 4294967040 }
 0x222   :  { %179 = vsyncpa [#allocation3], 1 }

</bundles_post_ra>
